<compile_context>
chip_gen: v6e
topology: v6e:2x2x1
jax: 0.10.0
libtpu: 0.0.40
codegen_flags: <defaults>
</compile_context>

<pallas_src>
import jax
import jax.numpy as jnp
import numpy as np
from jax.experimental import pallas as pl
from jax.experimental.pallas import tpu as pltpu

# ---- static config (synthetic, deterministic) -------------------------------
DIM = 4            # data dimension
HIDDEN = 32        # hidden_dims = [32]
N_LAYERS = 2       # n_layers
TM = 2048          # lane tile over flattened batch*seq rows (multiple of 128)
LN_EPS = 1e-5

IN_ROWS = 16       # input slab rows: [x(4); h(4); t(1); zero-pad(7)]
XH = 2 * DIM       # 8  : stacked [x; h] rows (loop-carried slab)
PQ = 4 * DIM       # 16 : stacked [px_s; px_q; ph_s; ph_q] rows == [scale8; shift8] rows
HH = 2 * HIDDEN    # 64 : stacked [ax; ah] rows == [hs; hq] rows

# packed column-vector slot indices
C_T, C_B1, C_G, C_E, C_B3 = range(5)     # (64, 1) columns
N_V64 = 5
C_WT, C_B2, C_B4 = range(3)              # (16, 1) columns
N_V16 = 3
C_M, C_OMM = range(2)                    # (8, 1)  columns
N_V8 = 2


# ---- shared math --------------------------------------------------------------
def _mxu(w_bf16, act):
    """Kernel MXU matmul: bf16 weights (pre-cast) x bf16 activations, f32 accumulate."""
    return jnp.dot(w_bf16, act.astype(jnp.bfloat16), preferred_element_type=jnp.float32)


def _bdot(a, b):
    """Reference matmul with the same bf16 truncation points as the kernel."""
    return jnp.dot(a.astype(jnp.bfloat16), b.astype(jnp.bfloat16),
                   preferred_element_type=jnp.float32)


def _ln_raw(v, eps=LN_EPS):
    """Affine-free LayerNorm over the feature (sublane) axis; v: (F, TM)."""
    mu = jnp.mean(v, axis=0, keepdims=True)
    var = jnp.mean(jnp.square(v - mu), axis=0, keepdims=True)
    return (v - mu) * jax.lax.rsqrt(var + eps)


def _layer_norm_last(v, g, b, eps=LN_EPS):
    """LayerNorm over the trailing feature axis (reference layout)."""
    mu = jnp.mean(v, axis=-1, keepdims=True)
    var = jnp.mean(jnp.square(v - mu), axis=-1, keepdims=True)
    return (v - mu) * jax.lax.rsqrt(var + eps) * g + b


# ---- Pallas kernel -------------------------------------------------------------
def _coupling_kernel(in_ref, w1_ref, w2_ref, w3_ref, w4_ref,
                     v64_ref, v16_ref, v8_ref, out_ref):
    xh = in_ref[0:XH, :]              # (8, TM)  rows 0:4 = x, 4:8 = h (feature-major)
    t = in_ref[XH:XH + 1, :]          # (1, TM)

    # static unroll over the flow layers (Flow.forward applies them in sequence)
    for l in range(N_LAYERS):
        w1 = w1_ref[l]                                   # (64,  8) bf16
        w2 = w2_ref[l]                                   # (16, 64) bf16
        w3 = w3_ref[l]                                   # (64, 16) bf16
        w4 = w4_ref[l]                                   # (16, 64) bf16
        c_t = v64_ref[l * N_V64 + C_T]                   # (64, 1) time columns
        c_b1 = v64_ref[l * N_V64 + C_B1]                 # (64, 1) first-layer biases
        c_g = v64_ref[l * N_V64 + C_G]                   # (64, 1) LN gains
        c_e = v64_ref[l * N_V64 + C_E]                   # (64, 1) LN biases
        c_b3 = v64_ref[l * N_V64 + C_B3]                 # (64, 1) merge hidden biases
        wt16 = v16_ref[l * N_V16 + C_WT]                 # (16, 1) TimeTanh weights
        b2 = v16_ref[l * N_V16 + C_B2]                   # (16, 1) head biases
        b4 = v16_ref[l * N_V16 + C_B4]                   # (16, 1) merge output biases
        m8 = v8_ref[l * N_V8 + C_M]                      # (8, 1)  [mask; mask]
        omm8 = v8_ref[l * N_V8 + C_OMM]                  # (8, 1)  [1-mask; 1-mask]

        zs = xh * m8                                     # [x*m; h*m]        (8, TM)

        # latent_net + latent_net_h first layers: one block-diag MXU push.
        a = _mxu(w1, zs) + c_t * t + c_b1                # [ax_pre; ah_pre]  (64, TM)
        a = jnp.concatenate([_ln_raw(a[:HIDDEN]), _ln_raw(a[HIDDEN:])], axis=0)
        a = jnp.tanh(a * c_g + c_e)

        # both 2*dim MlpLN heads for both branches, times TimeTanh: one matmul.
        tn = jnp.tanh(wt16 * t)                          # (16, TM)
        p = (_mxu(w2, a) + b2) * tn                      # [px_s;px_q;ph_s;ph_q]

        # merge_scale + merge_shift hidden layers: one matmul (weights pre-permuted).
        hsq = jnp.tanh(_mxu(w3, p) + c_b3)               # [hs; hq]          (64, TM)

        # merge output layers, padded to the 8-row slab: h rows get scale=0, shift=0.
        ss = _mxu(w4, hsq) + b4                          # [scale8; shift8]  (16, TM)
        scale8 = ss[:XH]
        shift8 = ss[XH:]

        # affine coupling on the whole [x; h] slab; the h rows reduce exactly to
        # h*m + (1-m)*h = h, so h is carried unchanged across layers.
        xh = zs + omm8 * (xh * jnp.exp(scale8) + shift8)

    out_ref[...] = xh                                    # (8, TM) full-vreg store


# ---- parameter construction (deterministic, synthetic; feature-last "PyTorch" form)
def init_params(key):
    L, D, H = N_LAYERS, DIM, HIDDEN
    D1 = D + 1

    def dense(k, fan_in, shape):
        return jax.random.normal(k, shape, jnp.float32) / np.sqrt(fan_in)

    keys = jax.random.split(key, 9)

    # 'none' if dim == 1 else 'ordered_{i % 2}'
    half = D // 2
    masks = []
    for l in range(L):
        if D == 1:
            m = jnp.ones((D,), jnp.float32)
        elif l % 2 == 0:
            m = jnp.concatenate([jnp.ones((half,)), jnp.zeros((D - half,))])
        else:
            m = jnp.concatenate([jnp.zeros((half,)), jnp.ones((D - half,))])
        masks.append(m.astype(jnp.float32))

    z = lambda *s: jnp.zeros(s, jnp.float32)
    o = lambda *s: jnp.ones(s, jnp.float32)

    return dict(
        mask=jnp.stack(masks),
        wt=dense(keys[0], 1, (L, 2 * D)),
        wx1=dense(keys[1], D1, (L, D1, H)), bx1=z(L, H), gx1=o(L, H), ex1=z(L, H),
        wx2=dense(keys[2], H, (L, H, 2 * D)), bx2=z(L, 2 * D),
        wh1=dense(keys[3], D1, (L, D1, H)), bh1=z(L, H), gh1=o(L, H), eh1=z(L, H),
        wh2=dense(keys[4], H, (L, H, 2 * D)), bh2=z(L, 2 * D),
        ws1=dense(keys[5], 2 * D, (L, 2 * D, H)), bs1=z(L, H),
        ws2=dense(keys[6], H, (L, H, D)), bs2=z(L, D),
        wq1=dense(keys[7], 2 * D, (L, 2 * D, H)), bq1=z(L, H),
        wq2=dense(keys[8], H, (L, H, D)), bq2=z(L, D),
    )


def pack_params(p):
    """Fuse per-layer weights into 4 block-diag/stacked bf16 packs + 3 f32 column packs."""
    L, D, H = N_LAYERS, DIM, HIDDEN
    pn = {k: np.asarray(v, np.float32) for k, v in p.items()}

    w1 = np.zeros((L, 2 * H, 2 * D), np.float32)    # [ax; ah] <- [z; hm]
    w2 = np.zeros((L, 4 * D, 2 * H), np.float32)    # [px_s; px_q; ph_s; ph_q] <- [ax; ah]
    w3 = np.zeros((L, 2 * H, 4 * D), np.float32)    # [hs; hq] <- p
    w4 = np.zeros((L, 4 * D, 2 * H), np.float32)    # [scale8; shift8] <- [hs; hq]
    v64 = np.zeros((L, N_V64, 2 * H), np.float32)
    v16 = np.zeros((L, N_V16, 4 * D), np.float32)
    v8 = np.zeros((L, N_V8, 2 * D), np.float32)

    for l in range(L):
        # M1: block-diag of the data-feature columns of wx1 / wh1
        w1[l, :H, :D] = pn["wx1"][l, :D, :].T
        w1[l, H:, D:] = pn["wh1"][l, :D, :].T
        # M2: block-diag of the 2*dim output heads (rows already ordered [scale; shift])
        w2[l, :2 * D, :H] = pn["wx2"][l].T
        w2[l, 2 * D:, H:] = pn["wh2"][l].T
        # M3: merge hidden layers, columns permuted to p's row order [px_s;px_q;ph_s;ph_q]
        w3[l, :H, 0:D] = pn["ws1"][l, :D, :].T
        w3[l, :H, 2 * D:3 * D] = pn["ws1"][l, D:, :].T
        w3[l, H:, D:2 * D] = pn["wq1"][l, :D, :].T
        w3[l, H:, 3 * D:4 * D] = pn["wq1"][l, D:, :].T
        # M4: merge output layers padded to 8 rows (h rows stay zero -> identity update)
        w4[l, 0:D, :H] = pn["ws2"][l].T
        w4[l, 2 * D:3 * D, H:] = pn["wq2"][l].T

        v64[l, C_T] = np.concatenate([pn["wx1"][l, D], pn["wh1"][l, D]])
        v64[l, C_B1] = np.concatenate([pn["bx1"][l], pn["bh1"][l]])
        v64[l, C_G] = np.concatenate([pn["gx1"][l], pn["gh1"][l]])
        v64[l, C_E] = np.concatenate([pn["ex1"][l], pn["eh1"][l]])
        v64[l, C_B3] = np.concatenate([pn["bs1"][l], pn["bq1"][l]])

        v16[l, C_WT] = np.concatenate([pn["wt"][l, :D], pn["wt"][l, D:],
                                       pn["wt"][l, :D], pn["wt"][l, D:]])
        v16[l, C_B2] = np.concatenate([pn["bx2"][l, :D], pn["bx2"][l, D:],
                                       pn["bh2"][l, :D], pn["bh2"][l, D:]])
        v16[l, C_B4] = np.concatenate([pn["bs2"][l], np.zeros(D, np.float32),
                                       pn["bq2"][l], np.zeros(D, np.float32)])

        v8[l, C_M] = np.concatenate([pn["mask"][l], pn["mask"][l]])
        v8[l, C_OMM] = 1.0 - v8[l, C_M]

    return (jnp.asarray(w1, jnp.bfloat16), jnp.asarray(w2, jnp.bfloat16),
            jnp.asarray(w3, jnp.bfloat16), jnp.asarray(w4, jnp.bfloat16),
            jnp.asarray(v64.reshape(L * N_V64, 2 * H, 1)),
            jnp.asarray(v16.reshape(L * N_V16, 4 * D, 1)),
            jnp.asarray(v8.reshape(L * N_V8, 2 * D, 1)))


# ---- wrapper: CouplingFlow_latent.forward(x, h, t) ----------------------------
def _round_up(v, m):
    return ((v + m - 1) // m) * m


def coupling_flow_latent(x, h, t, packed):
    S = t.shape[-2]
    if x.shape[-2] == 1:                      # x.repeat_interleave(t.shape[-2], dim=-2)
        x = jnp.repeat(x, S, axis=-2)
    if h is not None and h.shape[-2] == 1:
        h = jnp.repeat(h, S, axis=-2)
    # TODO(synk): t0 is None in this forward; flow.inverse(x, t=t0) is not implemented.

    B = x.shape[0]
    N = B * S

    # lane tile: big enough to amortize per-step overhead, but keep >= 2 balanced
    # grid steps whenever possible (v7x runs a "parallel" grid on 2 TensorCores).
    tm = min(TM, max(128, _round_up(pl.cdiv(N, 2), 128)))
    n_pad = pl.cdiv(N, tm) * tm

    # single feature-major input slab (one DMA stream): rows [x(4); h(4); t(1); 0-pad].
    flat = jnp.concatenate(
        [x.reshape(N, DIM), h.reshape(N, DIM), t.reshape(N, 1)],
        axis=-1).astype(jnp.float32)                                   # (N, 9)
    slab = jnp.zeros((IN_ROWS, n_pad), jnp.float32).at[:2 * DIM + 1, :N].set(flat.T)

    w1, w2, w3, w4, v64, v16, v8 = packed
    full = lambda a: pl.BlockSpec(a.shape, lambda i: (0,) * a.ndim)    # VMEM-resident

    out = pl.pallas_call(
        _coupling_kernel,
        out_shape=jax.ShapeDtypeStruct((XH, n_pad), jnp.float32),
        grid_spec=pltpu.PrefetchScalarGridSpec(
            num_scalar_prefetch=0,
            grid=(n_pad // tm,),
            in_specs=[pl.BlockSpec((IN_ROWS, tm), lambda i: (0, i)),
                      full(w1), full(w2), full(w3), full(w4),
                      full(v64), full(v16), full(v8)],
            out_specs=pl.BlockSpec((XH, tm), lambda i: (0, i)),
        ),
        compiler_params=pltpu.CompilerParams(
            dimension_semantics=("parallel",)),
    )(slab, w1, w2, w3, w4, v64, v16, v8)

    return out[:DIM, :N].T.reshape(B, S, DIM)


# ---- pure-JAX reference (feature-last, mirrors the module semantics) ----------
def reference(x, h, t, params):
    # The [z, t] concat is expressed as an equivalent split matmul + time column
    # (mathematically identical) so bf16 truncation points match the kernel.
    S = t.shape[-2]
    if x.shape[-2] == 1:
        x = jnp.repeat(x, S, axis=-2)
    if h.shape[-2] == 1:
        h = jnp.repeat(h, S, axis=-2)
    x = x.astype(jnp.float32)
    h = h.astype(jnp.float32)
    t = t.astype(jnp.float32)
    p = params
    D = DIM
    for l in range(N_LAYERS):
        m = p["mask"][l]
        z = x * m
        tn = jnp.tanh(t * p["wt"][l])                                    # TimeTanh
        ax = _bdot(z, p["wx1"][l][:D]) + t * p["wx1"][l][D] + p["bx1"][l]
        ax = jnp.tanh(_layer_norm_last(ax, p["gx1"][l], p["ex1"][l]))
        px = (_bdot(ax, p["wx2"][l]) + p["bx2"][l]) * tn
        ah = _bdot(h * m, p["wh1"][l][:D]) + t * p["wh1"][l][D] + p["bh1"][l]
        ah = jnp.tanh(_layer_norm_last(ah, p["gh1"][l], p["eh1"][l]))
        ph = (_bdot(ah, p["wh2"][l]) + p["bh2"][l]) * tn
        hs = jnp.tanh(_bdot(px[..., :D], p["ws1"][l][:D]) +
                      _bdot(ph[..., :D], p["ws1"][l][D:]) + p["bs1"][l])
        scale = _bdot(hs, p["ws2"][l]) + p["bs2"][l]
        hq = jnp.tanh(_bdot(px[..., D:], p["wq1"][l][:D]) +
                      _bdot(ph[..., D:], p["wq1"][l][D:]) + p["bq1"][l])
        shift = _bdot(hq, p["wq2"][l]) + p["bq2"][l]
        x = z + (1.0 - m) * (x * jnp.exp(scale) + shift)
    return x


if __name__ == "__main__":
    key = jax.random.PRNGKey(0)
    kp, kx, kh, kt = jax.random.split(key, 4)
    params = init_params(kp)
    packed = pack_params(params)

    # small case (single 128-lane tile) + multi-tile / padded case (N=500 -> 2x256)
    for (B, S) in ((2, 8), (2, 250)):
        kxi, khi, kti = (jax.random.fold_in(k, S) for k in (kx, kh, kt))
        x = jax.random.normal(kxi, (B, 1, DIM), jnp.float32)   # repeated along seq
        h = jax.random.normal(khi, (B, 1, DIM), jnp.float32)   # graph embedding
        t = jax.random.uniform(kti, (B, S, 1), jnp.float32)    # flow end times

        out = jax.block_until_ready(coupling_flow_latent(x, h, t, packed))
        ref = reference(x, h, t, params)
        # bf16 MXU operands (f32 accumulate) in both kernel and reference; tolerance
        # absorbs residual bf16-rounding / accumulation-order differences.
        np.testing.assert_allclose(np.asarray(out), np.asarray(ref),
                                   rtol=2e-3, atol=2e-3)

    print("KERNEL_OK")
</pallas_src>

<mosaic_0001>
module attributes {stable_mosaic.version = 11 : i64} {
  func.func @_coupling_kernel(%arg0: i32, %arg1: memref<16x128xf32, #tpu.memory_space<vmem>>, %arg2: memref<2x64x8xbf16, #tpu.memory_space<vmem>>, %arg3: memref<2x16x64xbf16, #tpu.memory_space<vmem>>, %arg4: memref<2x64x16xbf16, #tpu.memory_space<vmem>>, %arg5: memref<2x16x64xbf16, #tpu.memory_space<vmem>>, %arg6: memref<10x64x1xf32, #tpu.memory_space<vmem>>, %arg7: memref<6x16x1xf32, #tpu.memory_space<vmem>>, %arg8: memref<4x8x1xf32, #tpu.memory_space<vmem>>, %arg9: memref<8x128xf32, #tpu.memory_space<vmem>>) attributes {dimension_semantics = [#tpu.dimension_semantics<parallel>], iteration_bounds = array<i64: 1>, scalar_prefetch = 0 : i64, scratch_operands = 0 : i64, tpu.core_type = #tpu.core_type<tc>, window_params = [{transform_indices = @transform_0, window_bounds = array<i64: 16, 128>}, {pipeline_mode = #tpu.pipeline_mode<synchronous>, transform_indices = @transform_1, window_bounds = array<i64: 2, 64, 8>}, {pipeline_mode = #tpu.pipeline_mode<synchronous>, transform_indices = @transform_2, window_bounds = array<i64: 2, 16, 64>}, {pipeline_mode = #tpu.pipeline_mode<synchronous>, transform_indices = @transform_3, window_bounds = array<i64: 2, 64, 16>}, {pipeline_mode = #tpu.pipeline_mode<synchronous>, transform_indices = @transform_4, window_bounds = array<i64: 2, 16, 64>}, {pipeline_mode = #tpu.pipeline_mode<synchronous>, transform_indices = @transform_5, window_bounds = array<i64: 10, 64, 1>}, {pipeline_mode = #tpu.pipeline_mode<synchronous>, transform_indices = @transform_6, window_bounds = array<i64: 6, 16, 1>}, {pipeline_mode = #tpu.pipeline_mode<synchronous>, transform_indices = @transform_7, window_bounds = array<i64: 4, 8, 1>}, {transform_indices = @transform_8, window_bounds = array<i64: 8, 128>}]} {
    %c0 = arith.constant 0 : index
    %c0_0 = arith.constant 0 : index
    %0 = vector.load %arg1[%c0, %c0_0] : memref<16x128xf32, #tpu.memory_space<vmem>>, vector<8x128xf32>
    %c8 = arith.constant 8 : index
    %c0_1 = arith.constant 0 : index
    %1 = vector.load %arg1[%c8, %c0_1] : memref<16x128xf32, #tpu.memory_space<vmem>>, vector<1x128xf32>
    %c0_2 = arith.constant 0 : index
    %c0_3 = arith.constant 0 : index
    %c0_4 = arith.constant 0 : index
    %2 = vector.load %arg2[%c0_2, %c0_3, %c0_4] : memref<2x64x8xbf16, #tpu.memory_space<vmem>>, vector<1x64x8xbf16>
    %3 = vector.shape_cast %2 : vector<1x64x8xbf16> to vector<64x8xbf16>
    %c0_5 = arith.constant 0 : index
    %c0_6 = arith.constant 0 : index
    %c0_7 = arith.constant 0 : index
    %4 = vector.load %arg3[%c0_5, %c0_6, %c0_7] : memref<2x16x64xbf16, #tpu.memory_space<vmem>>, vector<1x16x64xbf16>
    %5 = vector.shape_cast %4 : vector<1x16x64xbf16> to vector<16x64xbf16>
    %c0_8 = arith.constant 0 : index
    %c0_9 = arith.constant 0 : index
    %c0_10 = arith.constant 0 : index
    %6 = vector.load %arg4[%c0_8, %c0_9, %c0_10] : memref<2x64x16xbf16, #tpu.memory_space<vmem>>, vector<1x64x16xbf16>
    %7 = vector.shape_cast %6 : vector<1x64x16xbf16> to vector<64x16xbf16>
    %c0_11 = arith.constant 0 : index
    %c0_12 = arith.constant 0 : index
    %c0_13 = arith.constant 0 : index
    %8 = vector.load %arg5[%c0_11, %c0_12, %c0_13] : memref<2x16x64xbf16, #tpu.memory_space<vmem>>, vector<1x16x64xbf16>
    %9 = vector.shape_cast %8 : vector<1x16x64xbf16> to vector<16x64xbf16>
    %c0_14 = arith.constant 0 : index
    %c0_15 = arith.constant 0 : index
    %c0_16 = arith.constant 0 : index
    %10 = vector.load %arg6[%c0_14, %c0_15, %c0_16] : memref<10x64x1xf32, #tpu.memory_space<vmem>>, vector<1x64x1xf32>
    %11 = vector.shape_cast %10 : vector<1x64x1xf32> to vector<64x1xf32>
    %c1 = arith.constant 1 : index
    %c0_17 = arith.constant 0 : index
    %c0_18 = arith.constant 0 : index
    %12 = vector.load %arg6[%c1, %c0_17, %c0_18] : memref<10x64x1xf32, #tpu.memory_space<vmem>>, vector<1x64x1xf32>
    %13 = vector.shape_cast %12 : vector<1x64x1xf32> to vector<64x1xf32>
    %c2 = arith.constant 2 : index
    %c0_19 = arith.constant 0 : index
    %c0_20 = arith.constant 0 : index
    %14 = vector.load %arg6[%c2, %c0_19, %c0_20] : memref<10x64x1xf32, #tpu.memory_space<vmem>>, vector<1x64x1xf32>
    %15 = vector.shape_cast %14 : vector<1x64x1xf32> to vector<64x1xf32>
    %c3 = arith.constant 3 : index
    %c0_21 = arith.constant 0 : index
    %c0_22 = arith.constant 0 : index
    %16 = vector.load %arg6[%c3, %c0_21, %c0_22] : memref<10x64x1xf32, #tpu.memory_space<vmem>>, vector<1x64x1xf32>
    %17 = vector.shape_cast %16 : vector<1x64x1xf32> to vector<64x1xf32>
    %c4 = arith.constant 4 : index
    %c0_23 = arith.constant 0 : index
    %c0_24 = arith.constant 0 : index
    %18 = vector.load %arg6[%c4, %c0_23, %c0_24] : memref<10x64x1xf32, #tpu.memory_space<vmem>>, vector<1x64x1xf32>
    %19 = vector.shape_cast %18 : vector<1x64x1xf32> to vector<64x1xf32>
    %c0_25 = arith.constant 0 : index
    %c0_26 = arith.constant 0 : index
    %c0_27 = arith.constant 0 : index
    %20 = vector.load %arg7[%c0_25, %c0_26, %c0_27] : memref<6x16x1xf32, #tpu.memory_space<vmem>>, vector<1x16x1xf32>
    %21 = vector.shape_cast %20 : vector<1x16x1xf32> to vector<16x1xf32>
    %c1_28 = arith.constant 1 : index
    %c0_29 = arith.constant 0 : index
    %c0_30 = arith.constant 0 : index
    %22 = vector.load %arg7[%c1_28, %c0_29, %c0_30] : memref<6x16x1xf32, #tpu.memory_space<vmem>>, vector<1x16x1xf32>
    %23 = vector.shape_cast %22 : vector<1x16x1xf32> to vector<16x1xf32>
    %c2_31 = arith.constant 2 : index
    %c0_32 = arith.constant 0 : index
    %c0_33 = arith.constant 0 : index
    %24 = vector.load %arg7[%c2_31, %c0_32, %c0_33] : memref<6x16x1xf32, #tpu.memory_space<vmem>>, vector<1x16x1xf32>
    %25 = vector.shape_cast %24 : vector<1x16x1xf32> to vector<16x1xf32>
    %c0_34 = arith.constant 0 : index
    %c0_35 = arith.constant 0 : index
    %c0_36 = arith.constant 0 : index
    %26 = vector.load %arg8[%c0_34, %c0_35, %c0_36] : memref<4x8x1xf32, #tpu.memory_space<vmem>>, vector<1x8x1xf32>
    %27 = vector.shape_cast %26 : vector<1x8x1xf32> to vector<8x1xf32>
    %c1_37 = arith.constant 1 : index
    %c0_38 = arith.constant 0 : index
    %c0_39 = arith.constant 0 : index
    %28 = vector.load %arg8[%c1_37, %c0_38, %c0_39] : memref<4x8x1xf32, #tpu.memory_space<vmem>>, vector<1x8x1xf32>
    %29 = vector.shape_cast %28 : vector<1x8x1xf32> to vector<8x1xf32>
    %30 = vector.broadcast %27 : vector<8x1xf32> to vector<8x128xf32>
    %31 = arith.mulf %0, %30 : vector<8x128xf32>
    %32 = arith.truncf %31 : vector<8x128xf32> to vector<8x128xbf16>
    %cst = arith.constant dense<0.000000e+00> : vector<64x128xf32>
    %33 = tpu.matmul %3, %32, %cst {dimension_numbers = #tpu.dot_dimension_numbers<[1], [0], [0], [1], [0, 0, 1, 1], [], []>} : vector<64x8xbf16>, vector<8x128xbf16>, vector<64x128xf32> -> vector<64x128xf32>
    %34 = vector.broadcast %11 : vector<64x1xf32> to vector<64x128xf32>
    %35 = vector.broadcast %1 : vector<1x128xf32> to vector<64x128xf32>
    %36 = arith.mulf %34, %35 : vector<64x128xf32>
    %37 = arith.addf %33, %36 : vector<64x128xf32>
    %38 = vector.broadcast %13 : vector<64x1xf32> to vector<64x128xf32>
    %39 = arith.addf %37, %38 : vector<64x128xf32>
    %40 = vector.extract_strided_slice %39 {offsets = [0, 0], sizes = [32, 128], strides = [1, 1]} : vector<64x128xf32> to vector<32x128xf32>
    %cst_40 = arith.constant dense<0.000000e+00> : vector<128xf32>
    %41 = vector.multi_reduction <add>, %40, %cst_40 [0] : vector<32x128xf32> to vector<128xf32>
    %42 = vector.shape_cast %41 : vector<128xf32> to vector<1x128xf32>
    %cst_41 = arith.constant 3.200000e+01 : f32
    %43 = vector.broadcast %cst_41 : f32 to vector<1x128xf32>
    %44 = arith.divf %42, %43 : vector<1x128xf32>
    %45 = vector.broadcast %44 : vector<1x128xf32> to vector<32x128xf32>
    %46 = arith.subf %40, %45 : vector<32x128xf32>
    %47 = arith.mulf %46, %46 : vector<32x128xf32>
    %cst_42 = arith.constant dense<0.000000e+00> : vector<128xf32>
    %48 = vector.multi_reduction <add>, %47, %cst_42 [0] : vector<32x128xf32> to vector<128xf32>
    %49 = vector.shape_cast %48 : vector<128xf32> to vector<1x128xf32>
    %cst_43 = arith.constant 3.200000e+01 : f32
    %50 = vector.broadcast %cst_43 : f32 to vector<1x128xf32>
    %51 = arith.divf %49, %50 : vector<1x128xf32>
    %52 = vector.broadcast %44 : vector<1x128xf32> to vector<32x128xf32>
    %53 = arith.subf %40, %52 : vector<32x128xf32>
    %cst_44 = arith.constant 9.99999974E-6 : f32
    %54 = vector.broadcast %cst_44 : f32 to vector<1x128xf32>
    %55 = arith.addf %51, %54 : vector<1x128xf32>
    %56 = math.rsqrt %55 : vector<1x128xf32>
    %57 = vector.broadcast %56 : vector<1x128xf32> to vector<32x128xf32>
    %58 = arith.mulf %53, %57 : vector<32x128xf32>
    %59 = vector.extract_strided_slice %39 {offsets = [32, 0], sizes = [32, 128], strides = [1, 1]} : vector<64x128xf32> to vector<32x128xf32>
    %cst_45 = arith.constant dense<0.000000e+00> : vector<128xf32>
    %60 = vector.multi_reduction <add>, %59, %cst_45 [0] : vector<32x128xf32> to vector<128xf32>
    %61 = vector.shape_cast %60 : vector<128xf32> to vector<1x128xf32>
    %cst_46 = arith.constant 3.200000e+01 : f32
    %62 = vector.broadcast %cst_46 : f32 to vector<1x128xf32>
    %63 = arith.divf %61, %62 : vector<1x128xf32>
    %64 = vector.broadcast %63 : vector<1x128xf32> to vector<32x128xf32>
    %65 = arith.subf %59, %64 : vector<32x128xf32>
    %66 = arith.mulf %65, %65 : vector<32x128xf32>
    %cst_47 = arith.constant dense<0.000000e+00> : vector<128xf32>
    %67 = vector.multi_reduction <add>, %66, %cst_47 [0] : vector<32x128xf32> to vector<128xf32>
    %68 = vector.shape_cast %67 : vector<128xf32> to vector<1x128xf32>
    %cst_48 = arith.constant 3.200000e+01 : f32
    %69 = vector.broadcast %cst_48 : f32 to vector<1x128xf32>
    %70 = arith.divf %68, %69 : vector<1x128xf32>
    %71 = vector.broadcast %63 : vector<1x128xf32> to vector<32x128xf32>
    %72 = arith.subf %59, %71 : vector<32x128xf32>
    %cst_49 = arith.constant 9.99999974E-6 : f32
    %73 = vector.broadcast %cst_49 : f32 to vector<1x128xf32>
    %74 = arith.addf %70, %73 : vector<1x128xf32>
    %75 = math.rsqrt %74 : vector<1x128xf32>
    %76 = vector.broadcast %75 : vector<1x128xf32> to vector<32x128xf32>
    %77 = arith.mulf %72, %76 : vector<32x128xf32>
    %78 = tpu.concatenate %58, %77 in 0 : vector<32x128xf32>, vector<32x128xf32> -> vector<64x128xf32>
    %79 = vector.broadcast %15 : vector<64x1xf32> to vector<64x128xf32>
    %80 = arith.mulf %78, %79 : vector<64x128xf32>
    %81 = vector.broadcast %17 : vector<64x1xf32> to vector<64x128xf32>
    %82 = arith.addf %80, %81 : vector<64x128xf32>
    %83 = math.tanh %82 : vector<64x128xf32>
    %84 = vector.broadcast %21 : vector<16x1xf32> to vector<16x128xf32>
    %85 = vector.broadcast %1 : vector<1x128xf32> to vector<16x128xf32>
    %86 = arith.mulf %84, %85 : vector<16x128xf32>
    %87 = math.tanh %86 : vector<16x128xf32>
    %88 = arith.truncf %83 : vector<64x128xf32> to vector<64x128xbf16>
    %cst_50 = arith.constant dense<0.000000e+00> : vector<16x128xf32>
    %89 = tpu.matmul %5, %88, %cst_50 {dimension_numbers = #tpu.dot_dimension_numbers<[1], [0], [0], [1], [0, 0, 1, 1], [], []>} : vector<16x64xbf16>, vector<64x128xbf16>, vector<16x128xf32> -> vector<16x128xf32>
    %90 = vector.broadcast %23 : vector<16x1xf32> to vector<16x128xf32>
    %91 = arith.addf %89, %90 : vector<16x128xf32>
    %92 = arith.mulf %91, %87 : vector<16x128xf32>
    %93 = arith.truncf %92 : vector<16x128xf32> to vector<16x128xbf16>
    %cst_51 = arith.constant dense<0.000000e+00> : vector<64x128xf32>
    %94 = tpu.matmul %7, %93, %cst_51 {dimension_numbers = #tpu.dot_dimension_numbers<[1], [0], [0], [1], [0, 0, 1, 1], [], []>} : vector<64x16xbf16>, vector<16x128xbf16>, vector<64x128xf32> -> vector<64x128xf32>
    %95 = vector.broadcast %19 : vector<64x1xf32> to vector<64x128xf32>
    %96 = arith.addf %94, %95 : vector<64x128xf32>
    %97 = math.tanh %96 : vector<64x128xf32>
    %98 = arith.truncf %97 : vector<64x128xf32> to vector<64x128xbf16>
    %cst_52 = arith.constant dense<0.000000e+00> : vector<16x128xf32>
    %99 = tpu.matmul %9, %98, %cst_52 {dimension_numbers = #tpu.dot_dimension_numbers<[1], [0], [0], [1], [0, 0, 1, 1], [], []>} : vector<16x64xbf16>, vector<64x128xbf16>, vector<16x128xf32> -> vector<16x128xf32>
    %100 = vector.broadcast %25 : vector<16x1xf32> to vector<16x128xf32>
    %101 = arith.addf %99, %100 : vector<16x128xf32>
    %102 = vector.extract_strided_slice %101 {offsets = [0, 0], sizes = [8, 128], strides = [1, 1]} : vector<16x128xf32> to vector<8x128xf32>
    %103 = vector.extract_strided_slice %101 {offsets = [8, 0], sizes = [8, 128], strides = [1, 1]} : vector<16x128xf32> to vector<8x128xf32>
    %104 = math.exp %102 : vector<8x128xf32>
    %105 = arith.mulf %0, %104 : vector<8x128xf32>
    %106 = arith.addf %105, %103 : vector<8x128xf32>
    %107 = vector.broadcast %29 : vector<8x1xf32> to vector<8x128xf32>
    %108 = arith.mulf %107, %106 : vector<8x128xf32>
    %109 = arith.addf %31, %108 : vector<8x128xf32>
    %c1_53 = arith.constant 1 : index
    %c0_54 = arith.constant 0 : index
    %c0_55 = arith.constant 0 : index
    %110 = vector.load %arg2[%c1_53, %c0_54, %c0_55] : memref<2x64x8xbf16, #tpu.memory_space<vmem>>, vector<1x64x8xbf16>
    %111 = vector.shape_cast %110 : vector<1x64x8xbf16> to vector<64x8xbf16>
    %c1_56 = arith.constant 1 : index
    %c0_57 = arith.constant 0 : index
    %c0_58 = arith.constant 0 : index
    %112 = vector.load %arg3[%c1_56, %c0_57, %c0_58] : memref<2x16x64xbf16, #tpu.memory_space<vmem>>, vector<1x16x64xbf16>
    %113 = vector.shape_cast %112 : vector<1x16x64xbf16> to vector<16x64xbf16>
    %c1_59 = arith.constant 1 : index
    %c0_60 = arith.constant 0 : index
    %c0_61 = arith.constant 0 : index
    %114 = vector.load %arg4[%c1_59, %c0_60, %c0_61] : memref<2x64x16xbf16, #tpu.memory_space<vmem>>, vector<1x64x16xbf16>
    %115 = vector.shape_cast %114 : vector<1x64x16xbf16> to vector<64x16xbf16>
    %c1_62 = arith.constant 1 : index
    %c0_63 = arith.constant 0 : index
    %c0_64 = arith.constant 0 : index
    %116 = vector.load %arg5[%c1_62, %c0_63, %c0_64] : memref<2x16x64xbf16, #tpu.memory_space<vmem>>, vector<1x16x64xbf16>
    %117 = vector.shape_cast %116 : vector<1x16x64xbf16> to vector<16x64xbf16>
    %c5 = arith.constant 5 : index
    %c0_65 = arith.constant 0 : index
    %c0_66 = arith.constant 0 : index
    %118 = vector.load %arg6[%c5, %c0_65, %c0_66] : memref<10x64x1xf32, #tpu.memory_space<vmem>>, vector<1x64x1xf32>
    %119 = vector.shape_cast %118 : vector<1x64x1xf32> to vector<64x1xf32>
    %c6 = arith.constant 6 : index
    %c0_67 = arith.constant 0 : index
    %c0_68 = arith.constant 0 : index
    %120 = vector.load %arg6[%c6, %c0_67, %c0_68] : memref<10x64x1xf32, #tpu.memory_space<vmem>>, vector<1x64x1xf32>
    %121 = vector.shape_cast %120 : vector<1x64x1xf32> to vector<64x1xf32>
    %c7 = arith.constant 7 : index
    %c0_69 = arith.constant 0 : index
    %c0_70 = arith.constant 0 : index
    %122 = vector.load %arg6[%c7, %c0_69, %c0_70] : memref<10x64x1xf32, #tpu.memory_space<vmem>>, vector<1x64x1xf32>
    %123 = vector.shape_cast %122 : vector<1x64x1xf32> to vector<64x1xf32>
    %c8_71 = arith.constant 8 : index
    %c0_72 = arith.constant 0 : index
    %c0_73 = arith.constant 0 : index
    %124 = vector.load %arg6[%c8_71, %c0_72, %c0_73] : memref<10x64x1xf32, #tpu.memory_space<vmem>>, vector<1x64x1xf32>
    %125 = vector.shape_cast %124 : vector<1x64x1xf32> to vector<64x1xf32>
    %c9 = arith.constant 9 : index
    %c0_74 = arith.constant 0 : index
    %c0_75 = arith.constant 0 : index
    %126 = vector.load %arg6[%c9, %c0_74, %c0_75] : memref<10x64x1xf32, #tpu.memory_space<vmem>>, vector<1x64x1xf32>
    %127 = vector.shape_cast %126 : vector<1x64x1xf32> to vector<64x1xf32>
    %c3_76 = arith.constant 3 : index
    %c0_77 = arith.constant 0 : index
    %c0_78 = arith.constant 0 : index
    %128 = vector.load %arg7[%c3_76, %c0_77, %c0_78] : memref<6x16x1xf32, #tpu.memory_space<vmem>>, vector<1x16x1xf32>
    %129 = vector.shape_cast %128 : vector<1x16x1xf32> to vector<16x1xf32>
    %c4_79 = arith.constant 4 : index
    %c0_80 = arith.constant 0 : index
    %c0_81 = arith.constant 0 : index
    %130 = vector.load %arg7[%c4_79, %c0_80, %c0_81] : memref<6x16x1xf32, #tpu.memory_space<vmem>>, vector<1x16x1xf32>
    %131 = vector.shape_cast %130 : vector<1x16x1xf32> to vector<16x1xf32>
    %c5_82 = arith.constant 5 : index
    %c0_83 = arith.constant 0 : index
    %c0_84 = arith.constant 0 : index
    %132 = vector.load %arg7[%c5_82, %c0_83, %c0_84] : memref<6x16x1xf32, #tpu.memory_space<vmem>>, vector<1x16x1xf32>
    %133 = vector.shape_cast %132 : vector<1x16x1xf32> to vector<16x1xf32>
    %c2_85 = arith.constant 2 : index
    %c0_86 = arith.constant 0 : index
    %c0_87 = arith.constant 0 : index
    %134 = vector.load %arg8[%c2_85, %c0_86, %c0_87] : memref<4x8x1xf32, #tpu.memory_space<vmem>>, vector<1x8x1xf32>
    %135 = vector.shape_cast %134 : vector<1x8x1xf32> to vector<8x1xf32>
    %c3_88 = arith.constant 3 : index
    %c0_89 = arith.constant 0 : index
    %c0_90 = arith.constant 0 : index
    %136 = vector.load %arg8[%c3_88, %c0_89, %c0_90] : memref<4x8x1xf32, #tpu.memory_space<vmem>>, vector<1x8x1xf32>
    %137 = vector.shape_cast %136 : vector<1x8x1xf32> to vector<8x1xf32>
    %138 = vector.broadcast %135 : vector<8x1xf32> to vector<8x128xf32>
    %139 = arith.mulf %109, %138 : vector<8x128xf32>
    %140 = arith.truncf %139 : vector<8x128xf32> to vector<8x128xbf16>
    %cst_91 = arith.constant dense<0.000000e+00> : vector<64x128xf32>
    %141 = tpu.matmul %111, %140, %cst_91 {dimension_numbers = #tpu.dot_dimension_numbers<[1], [0], [0], [1], [0, 0, 1, 1], [], []>} : vector<64x8xbf16>, vector<8x128xbf16>, vector<64x128xf32> -> vector<64x128xf32>
    %142 = vector.broadcast %119 : vector<64x1xf32> to vector<64x128xf32>
    %143 = vector.broadcast %1 : vector<1x128xf32> to vector<64x128xf32>
    %144 = arith.mulf %142, %143 : vector<64x128xf32>
    %145 = arith.addf %141, %144 : vector<64x128xf32>
    %146 = vector.broadcast %121 : vector<64x1xf32> to vector<64x128xf32>
    %147 = arith.addf %145, %146 : vector<64x128xf32>
    %148 = vector.extract_strided_slice %147 {offsets = [0, 0], sizes = [32, 128], strides = [1, 1]} : vector<64x128xf32> to vector<32x128xf32>
    %cst_92 = arith.constant dense<0.000000e+00> : vector<128xf32>
    %149 = vector.multi_reduction <add>, %148, %cst_92 [0] : vector<32x128xf32> to vector<128xf32>
    %150 = vector.shape_cast %149 : vector<128xf32> to vector<1x128xf32>
    %cst_93 = arith.constant 3.200000e+01 : f32
    %151 = vector.broadcast %cst_93 : f32 to vector<1x128xf32>
    %152 = arith.divf %150, %151 : vector<1x128xf32>
    %153 = vector.broadcast %152 : vector<1x128xf32> to vector<32x128xf32>
    %154 = arith.subf %148, %153 : vector<32x128xf32>
    %155 = arith.mulf %154, %154 : vector<32x128xf32>
    %cst_94 = arith.constant dense<0.000000e+00> : vector<128xf32>
    %156 = vector.multi_reduction <add>, %155, %cst_94 [0] : vector<32x128xf32> to vector<128xf32>
    %157 = vector.shape_cast %156 : vector<128xf32> to vector<1x128xf32>
    %cst_95 = arith.constant 3.200000e+01 : f32
    %158 = vector.broadcast %cst_95 : f32 to vector<1x128xf32>
    %159 = arith.divf %157, %158 : vector<1x128xf32>
    %160 = vector.broadcast %152 : vector<1x128xf32> to vector<32x128xf32>
    %161 = arith.subf %148, %160 : vector<32x128xf32>
    %cst_96 = arith.constant 9.99999974E-6 : f32
    %162 = vector.broadcast %cst_96 : f32 to vector<1x128xf32>
    %163 = arith.addf %159, %162 : vector<1x128xf32>
    %164 = math.rsqrt %163 : vector<1x128xf32>
    %165 = vector.broadcast %164 : vector<1x128xf32> to vector<32x128xf32>
    %166 = arith.mulf %161, %165 : vector<32x128xf32>
    %167 = vector.extract_strided_slice %147 {offsets = [32, 0], sizes = [32, 128], strides = [1, 1]} : vector<64x128xf32> to vector<32x128xf32>
    %cst_97 = arith.constant dense<0.000000e+00> : vector<128xf32>
    %168 = vector.multi_reduction <add>, %167, %cst_97 [0] : vector<32x128xf32> to vector<128xf32>
    %169 = vector.shape_cast %168 : vector<128xf32> to vector<1x128xf32>
    %cst_98 = arith.constant 3.200000e+01 : f32
    %170 = vector.broadcast %cst_98 : f32 to vector<1x128xf32>
    %171 = arith.divf %169, %170 : vector<1x128xf32>
    %172 = vector.broadcast %171 : vector<1x128xf32> to vector<32x128xf32>
    %173 = arith.subf %167, %172 : vector<32x128xf32>
    %174 = arith.mulf %173, %173 : vector<32x128xf32>
    %cst_99 = arith.constant dense<0.000000e+00> : vector<128xf32>
    %175 = vector.multi_reduction <add>, %174, %cst_99 [0] : vector<32x128xf32> to vector<128xf32>
    %176 = vector.shape_cast %175 : vector<128xf32> to vector<1x128xf32>
    %cst_100 = arith.constant 3.200000e+01 : f32
    %177 = vector.broadcast %cst_100 : f32 to vector<1x128xf32>
    %178 = arith.divf %176, %177 : vector<1x128xf32>
    %179 = vector.broadcast %171 : vector<1x128xf32> to vector<32x128xf32>
    %180 = arith.subf %167, %179 : vector<32x128xf32>
    %cst_101 = arith.constant 9.99999974E-6 : f32
    %181 = vector.broadcast %cst_101 : f32 to vector<1x128xf32>
    %182 = arith.addf %178, %181 : vector<1x128xf32>
    %183 = math.rsqrt %182 : vector<1x128xf32>
    %184 = vector.broadcast %183 : vector<1x128xf32> to vector<32x128xf32>
    %185 = arith.mulf %180, %184 : vector<32x128xf32>
    %186 = tpu.concatenate %166, %185 in 0 : vector<32x128xf32>, vector<32x128xf32> -> vector<64x128xf32>
    %187 = vector.broadcast %123 : vector<64x1xf32> to vector<64x128xf32>
    %188 = arith.mulf %186, %187 : vector<64x128xf32>
    %189 = vector.broadcast %125 : vector<64x1xf32> to vector<64x128xf32>
    %190 = arith.addf %188, %189 : vector<64x128xf32>
    %191 = math.tanh %190 : vector<64x128xf32>
    %192 = vector.broadcast %129 : vector<16x1xf32> to vector<16x128xf32>
    %193 = vector.broadcast %1 : vector<1x128xf32> to vector<16x128xf32>
    %194 = arith.mulf %192, %193 : vector<16x128xf32>
    %195 = math.tanh %194 : vector<16x128xf32>
    %196 = arith.truncf %191 : vector<64x128xf32> to vector<64x128xbf16>
    %cst_102 = arith.constant dense<0.000000e+00> : vector<16x128xf32>
    %197 = tpu.matmul %113, %196, %cst_102 {dimension_numbers = #tpu.dot_dimension_numbers<[1], [0], [0], [1], [0, 0, 1, 1], [], []>} : vector<16x64xbf16>, vector<64x128xbf16>, vector<16x128xf32> -> vector<16x128xf32>
    %198 = vector.broadcast %131 : vector<16x1xf32> to vector<16x128xf32>
    %199 = arith.addf %197, %198 : vector<16x128xf32>
    %200 = arith.mulf %199, %195 : vector<16x128xf32>
    %201 = arith.truncf %200 : vector<16x128xf32> to vector<16x128xbf16>
    %cst_103 = arith.constant dense<0.000000e+00> : vector<64x128xf32>
    %202 = tpu.matmul %115, %201, %cst_103 {dimension_numbers = #tpu.dot_dimension_numbers<[1], [0], [0], [1], [0, 0, 1, 1], [], []>} : vector<64x16xbf16>, vector<16x128xbf16>, vector<64x128xf32> -> vector<64x128xf32>
    %203 = vector.broadcast %127 : vector<64x1xf32> to vector<64x128xf32>
    %204 = arith.addf %202, %203 : vector<64x128xf32>
    %205 = math.tanh %204 : vector<64x128xf32>
    %206 = arith.truncf %205 : vector<64x128xf32> to vector<64x128xbf16>
    %cst_104 = arith.constant dense<0.000000e+00> : vector<16x128xf32>
    %207 = tpu.matmul %117, %206, %cst_104 {dimension_numbers = #tpu.dot_dimension_numbers<[1], [0], [0], [1], [0, 0, 1, 1], [], []>} : vector<16x64xbf16>, vector<64x128xbf16>, vector<16x128xf32> -> vector<16x128xf32>
    %208 = vector.broadcast %133 : vector<16x1xf32> to vector<16x128xf32>
    %209 = arith.addf %207, %208 : vector<16x128xf32>
    %210 = vector.extract_strided_slice %209 {offsets = [0, 0], sizes = [8, 128], strides = [1, 1]} : vector<16x128xf32> to vector<8x128xf32>
    %211 = vector.extract_strided_slice %209 {offsets = [8, 0], sizes = [8, 128], strides = [1, 1]} : vector<16x128xf32> to vector<8x128xf32>
    %212 = math.exp %210 : vector<8x128xf32>
    %213 = arith.mulf %109, %212 : vector<8x128xf32>
    %214 = arith.addf %213, %211 : vector<8x128xf32>
    %215 = vector.broadcast %137 : vector<8x1xf32> to vector<8x128xf32>
    %216 = arith.mulf %215, %214 : vector<8x128xf32>
    %217 = arith.addf %139, %216 : vector<8x128xf32>
    %c0_105 = arith.constant 0 : index
    %c0_106 = arith.constant 0 : index
    %218 = vector.load %arg9[%c0_105, %c0_106] : memref<8x128xf32, #tpu.memory_space<vmem>>, vector<8x128xf32>
    tpu.vector_store %arg9[%c0_105, %c0_106], %217 {strides = array<i32>} : memref<8x128xf32, #tpu.memory_space<vmem>>, vector<8x128xf32>,
    return
  }
  func.func @transform_0(%arg0: i32) -> (i32, i32) {
    %c0_i32 = arith.constant 0 : i32
    %c0_i32_0 = arith.constant 0 : i32
    return %c0_i32, %arg0 : i32, i32
  }
  func.func @transform_1(%arg0: i32) -> (i32, i32, i32) {
    %c0_i32 = arith.constant 0 : i32
    %c0_i32_0 = arith.constant 0 : i32
    %c0_i32_1 = arith.constant 0 : i32
    %c0_i32_2 = arith.constant 0 : i32
    return %c0_i32, %c0_i32_0, %c0_i32_1 : i32, i32, i32
  }
  func.func @transform_2(%arg0: i32) -> (i32, i32, i32) {
    %c0_i32 = arith.constant 0 : i32
    %c0_i32_0 = arith.constant 0 : i32
    %c0_i32_1 = arith.constant 0 : i32
    %c0_i32_2 = arith.constant 0 : i32
    return %c0_i32, %c0_i32_0, %c0_i32_1 : i32, i32, i32
  }
  func.func @transform_3(%arg0: i32) -> (i32, i32, i32) {
    %c0_i32 = arith.constant 0 : i32
    %c0_i32_0 = arith.constant 0 : i32
    %c0_i32_1 = arith.constant 0 : i32
    %c0_i32_2 = arith.constant 0 : i32
    return %c0_i32, %c0_i32_0, %c0_i32_1 : i32, i32, i32
  }
  func.func @transform_4(%arg0: i32) -> (i32, i32, i32) {
    %c0_i32 = arith.constant 0 : i32
    %c0_i32_0 = arith.constant 0 : i32
    %c0_i32_1 = arith.constant 0 : i32
    %c0_i32_2 = arith.constant 0 : i32
    return %c0_i32, %c0_i32_0, %c0_i32_1 : i32, i32, i32
  }
  func.func @transform_5(%arg0: i32) -> (i32, i32, i32) {
    %c0_i32 = arith.constant 0 : i32
    %c0_i32_0 = arith.constant 0 : i32
    %c0_i32_1 = arith.constant 0 : i32
    %c0_i32_2 = arith.constant 0 : i32
    return %c0_i32, %c0_i32_0, %c0_i32_1 : i32, i32, i32
  }
  func.func @transform_6(%arg0: i32) -> (i32, i32, i32) {
    %c0_i32 = arith.constant 0 : i32
    %c0_i32_0 = arith.constant 0 : i32
    %c0_i32_1 = arith.constant 0 : i32
    %c0_i32_2 = arith.constant 0 : i32
    return %c0_i32, %c0_i32_0, %c0_i32_1 : i32, i32, i32
  }
  func.func @transform_7(%arg0: i32) -> (i32, i32, i32) {
    %c0_i32 = arith.constant 0 : i32
    %c0_i32_0 = arith.constant 0 : i32
    %c0_i32_1 = arith.constant 0 : i32
    %c0_i32_2 = arith.constant 0 : i32
    return %c0_i32, %c0_i32_0, %c0_i32_1 : i32, i32, i32
  }
  func.func @transform_8(%arg0: i32) -> (i32, i32) {
    %c0_i32 = arith.constant 0 : i32
    %c0_i32_0 = arith.constant 0 : i32
    return %c0_i32, %arg0 : i32, i32
  }
}

</mosaic_0001>

<bundles_post_ra>
// kernel: tpu_custom_call.1
= control target key start
LH: loop header
LB: loop body
LE: loop exit
PB: predicated region body
PF: predicated region fallthrough
CT: control target
= control target key end

     0   :  { %v1970_v1 = vmov 0   ;;  %vm187_vm0 = vcmask 64512   ;;  %s2484_s0 = inlined_call_operand.vmem [shape: f32[16,128], index: 0, kind: input, shape index: {}]   ;;  %s2485_s1 = inlined_call_operand.vmem [shape: bf16[2,64,8], index: 1, kind: input, shape index: {}]   ;;  %s2486_s2 = inlined_call_operand.vmem [shape: bf16[2,16,64], index: 2, kind: input, shape index: {}]   ;;  %s2487_s3 = inlined_call_operand.vmem [shape: bf16[2,64,16], index: 3, kind: input, shape index: {}]   ;;  %s2488_s4 = inlined_call_operand.vmem [shape: bf16[2,16,64], index: 4, kind: input, shape index: {}]   ;;  %s2489_s5 = inlined_call_operand.vmem [shape: f32[10,64,1], index: 5, kind: input, shape index: {}]   ;;  %s2490_s6 = inlined_call_operand.vmem [shape: f32[6,16,1], index: 6, kind: input, shape index: {}]   ;;  %s2491_s7 = inlined_call_operand.vmem [shape: f32[4,8,1], index: 7, kind: input, shape index: {}]   ;;  %s2492_s8 = inlined_call_operand.hbm [shape: f32[8,128], index: 8, kind: output, shape index: {}]  }
   0x1   :  { %v105_v0 = vld [vmem:[%s2491_s7] sm:$0xff]  ;;  %1842 = vset.pattern.permute.xlu0 %v1970_v1  ;;  %1843 = vset.pattern.permute.xlu1 %v1970_v1  ;;  %v58_v2 = vld [vmem:[%s2489_s5 + $0x28] sm:$0xff]  ;;  %v59_v4 = vld [vmem:[%s2489_s5 + $0x30] sm:$0xff] }
   0x2   :  { %110 = vperm.xlu0 %1842, %v105_v0   ;;  %142 = vperm.xlu1 %1843, %v58_v2   ;;  %v57_v3 = vld [vmem:[%s2489_s5 + $0x20] sm:$0xff]  ;;  %v60_v5 = vld [vmem:[%s2489_s5 + $0x38] sm:$0xff]  ;;  %v1567_v7 = vld [vmem:[%s2489_s5 + $0x68] sm:$0xff] }
   0x3   :  { %v1566_v6 = vld [vmem:[%s2489_s5 + $0x60] sm:$0xff]  ;;  %v1568_v8 = vld [vmem:[%s2489_s5 + $0x70] sm:$0xff]  ;;  %v54_v10 = vld [vmem:[%s2489_s5 + $0x8] sm:$0xff] }
   0x4   :  { %v53_v9 = vld [vmem:[%s2489_s5] sm:$0xff]  ;;  %v1569_v11 = vld [vmem:[%s2489_s5 + $0x78] sm:$0xff]  ;;  %v55_v12 = vld [vmem:[%s2489_s5 + $0x10] sm:$0xff] }
   0x5   :  { %v56_v13 = vld [vmem:[%s2489_s5 + $0x18] sm:$0xff]  ;;  %v1844_v14 = vld [vmem:[%s2485_s1] sm:$0xff]   ;;  %v1563_v16 = vld [vmem:[%s2489_s5 + $0x48] sm:$0xff] }
   0x6   :  { %137 = vperm.xlu0 %1842, %v57_v3   ;;  %147 = vperm.xlu1 %1843, %v59_v4   ;;  %v1562_v15 = vld [vmem:[%s2489_s5 + $0x40] sm:$0xff]  ;;  %v1564_v17 = vld [vmem:[%s2489_s5 + $0x50] sm:$0xff]  ;;  %v1565_v18 = vld [vmem:[%s2489_s5 + $0x58] sm:$0xff] }
   0x7   :  { %1750 = vmatprep.mubr.msk.bf16.mxu0 %vm187_vm0, %v1844_v14  ;;  %v1576_v19 = vld [vmem:[%s2489_s5 + $0xb0] sm:$0xff]  ;;  %v1577_v20 = vld [vmem:[%s2489_s5 + $0xb8] sm:$0xff]  ;;  %v1574_v23 = vld [vmem:[%s2489_s5 + $0xa0] sm:$0xff] }
   0x8   :  { %v1584_v21 = vld [vmem:[%s2489_s5 + $0xf0] sm:$0xff]  ;;  %v1585_v22 = vld [vmem:[%s2489_s5 + $0xf8] sm:$0xff]  ;;  %v1575_v24 = vld [vmem:[%s2489_s5 + $0xa8] sm:$0xff] }
   0x9   :  { %v1582_v25 = vld [vmem:[%s2489_s5 + $0xe0] sm:$0xff] }
   0xa   :  { %152 = vperm.xlu0 %1842, %v60_v5   ;;  %291 = vperm.xlu1 %1843, %v1566_v6  }
   0xe   :  { %296 = vperm.xlu0 %1842, %v1567_v7   ;;  %301 = vperm.xlu1 %1843, %v1568_v8  }
  0x12   :  { %117 = vperm.xlu0 %1842, %v53_v9   ;;  %122 = vperm.xlu1 %1843, %v54_v10  }
  0x16   :  { %306 = vperm.xlu0 %1842, %v1569_v11   ;;  %127 = vperm.xlu1 %1843, %v55_v12  }
  0x1a   :  { %132 = vperm.xlu0 %1842, %v56_v13   ;;  %271 = vperm.xlu1 %1843, %v1562_v15  }
  0x1e   :  { %276 = vperm.xlu0 %1842, %v1563_v16   ;;  %281 = vperm.xlu1 %1843, %v1564_v17  }
  0x22   :  { %286 = vperm.xlu0 %1842, %v1565_v18   ;;  %418 = vperm.xlu1 %1843, %v1576_v19  }
  0x26   :  { %423 = vperm.xlu0 %1842, %v1577_v20   ;;  %466 = vperm.xlu1 %1843, %v1584_v21  }
  0x2a   :  { %471 = vperm.xlu0 %1842, %v1585_v22   ;;  %408 = vperm.xlu1 %1843, %v1574_v23  }
  0x2b   :  { %13 = vsyncpa [#allocation3], 0  ;;  %v1583_v26 = vld [vmem:[%s2489_s5 + $0xe8] sm:$0xff]  ;;  %v1572_v27 = vld [vmem:[%s2489_s5 + $0x90] sm:$0xff]  ;;  %vm200_vm1 = vcmask 1043456   ;;  %vm1972_vm2 = vmmov 0  }
  0x2c   :  { %v1573_v28 = vld [vmem:[%s2489_s5 + $0x98] sm:$0xff]  ;;  %v1580_v29 = vld [vmem:[%s2489_s5 + $0xd0] sm:$0xff]  ;;  %v1570_v31 = vld [vmem:[%s2489_s5 + $0x80] sm:$0xff]  ;;  %vm523_vm3 = vcmask 523264   ;;  %vm631_vm4 = vcmask 130048   ;;  %s1973_s10 = smov [#allocation2]  }
  0x2d   :  { %v1581_v30 = vld [vmem:[%s2489_s5 + $0xd8] sm:$0xff]  ;;  %v1571_v32 = vld [vmem:[%s2489_s5 + $0x88] sm:$0xff]  ;;  %v1578_v33 = vld [vmem:[%s2489_s5 + $0xc0] sm:$0xff] }
  0x2e   :  { %413 = vperm.xlu0 %1842, %v1575_v24   ;;  %456 = vperm.xlu1 %1843, %v1582_v25   ;;  %v1579_v34 = vld [vmem:[%s2489_s5 + $0xc8] sm:$0xff]  ;;  %v97_v35 = vld [vmem:[%s2490_s6] sm:$0xff]  ;;  %v1594_v37 = vld [vmem:[%s2490_s6 + $0x10] sm:$0xff] }
  0x2f   :  { %v98_v36 = vld [vmem:[%s2490_s6 + $0x8] sm:$0xff]  ;;  %v1595_v38 = vld [vmem:[%s2490_s6 + $0x18] sm:$0xff]  ;;  %v1592_v39 = vld [vmem:[%s2489_s5 + $0x130] sm:$0xff] }
  0x30   :  { %v1593_v40 = vld [vmem:[%s2489_s5 + $0x138] sm:$0xff]  ;;  %v1590_v41 = vld [vmem:[%s2489_s5 + $0x120] sm:$0xff]  ;;  %v1591_v42 = vld [vmem:[%s2489_s5 + $0x128] sm:$0xff] }
  0x31   :  { %v1588_v43 = vld [vmem:[%s2489_s5 + $0x110] sm:$0xff]  ;;  %v1589_v44 = vld [vmem:[%s2489_s5 + $0x118] sm:$0xff]  ;;  %v1586_v45 = vld [vmem:[%s2489_s5 + $0x100] sm:$0xff] }
  0x32   :  { %461 = vperm.xlu0 %1842, %v1583_v26   ;;  %398 = vperm.xlu1 %1843, %v1572_v27   ;;  %v1587_v46 = vld [vmem:[%s2489_s5 + $0x108] sm:$0xff]  ;;  %v1596_v47 = vld [vmem:[%s2490_s6 + $0x20] sm:$0xff]  ;;  %v1686_v50 = vld [vmem:[%s2491_s7 + $0x10] sm:$0xff] }
  0x33   :  { %v1597_v48 = vld [vmem:[%s2490_s6 + $0x28] sm:$0xff]  ;;  %v1644_v51 = vld [vmem:[%s2489_s5 + $0x160] sm:$0xff]  ;;  %v1646_v53 = vld [vmem:[%s2489_s5 + $0x170] sm:$0xff] }
  0x34   :  { %v1598_v49 = vld [vmem:[%s2491_s7 + $0x8] sm:$0xff]  ;;  %v1647_v54 = vld [vmem:[%s2489_s5 + $0x178] sm:$0xff]  ;;  %v1652_v55 = vld [vmem:[%s2489_s5 + $0x1a0] sm:$0xff] }
  0x35   :  { %v1645_v52 = vld [vmem:[%s2489_s5 + $0x168] sm:$0xff]  ;;  %v1654_v57 = vld [vmem:[%s2489_s5 + $0x1b0] sm:$0xff]  ;;  %v1640_v58 = vld [vmem:[%s2489_s5 + $0x140] sm:$0xff] }
  0x36   :  { %403 = vperm.xlu0 %1842, %v1573_v28   ;;  %446 = vperm.xlu1 %1843, %v1580_v29   ;;  %v1653_v56 = vld [vmem:[%s2489_s5 + $0x1a8] sm:$0xff]  ;;  %v1655_v60 = vld [vmem:[%s2489_s5 + $0x1b8] sm:$0xff]  ;;  %v1642_v61 = vld [vmem:[%s2489_s5 + $0x150] sm:$0xff] }
  0x37   :  { %v1641_v59 = vld [vmem:[%s2489_s5 + $0x148] sm:$0xff]  ;;  %v1643_v62 = vld [vmem:[%s2489_s5 + $0x158] sm:$0xff]  ;;  %v1648_v63 = vld [vmem:[%s2489_s5 + $0x180] sm:$0xff] }
  0x38   :  { %v2212_v0 = vld [vmem:[%s2484_s0] sm:$0xff]  ;;  %v1649_v1 = vld [vmem:[%s2489_s5 + $0x188] sm:$0xff]  ;;  %v1650_v2 = vld [vmem:[%s2489_s5 + $0x190] sm:$0xff] }
  0x39   :  { %v1651_v5 = vld [vmem:[%s2489_s5 + $0x198] sm:$0xff]  ;;  %v1662_v7 = vld [vmem:[%s2489_s5 + $0x1f0] sm:$0xff]  ;;  %v1845_v9 = vld [vmem:[%s2485_s1 + $0x8] sm:$0xff]  }
  0x3a   :  { %451 = vperm.xlu0 %1842, %v1581_v30   ;;  %388 = vperm.xlu1 %1843, %v1570_v31   ;;  %v1663_v10 = vld [vmem:[%s2489_s5 + $0x1f8] sm:$0xff]  ;;  %v1846_v11 = vld [vmem:[%s2485_s1 + $0x10] sm:$0xff]   ;;  %v1660_v14 = vld [vmem:[%s2489_s5 + $0x1e0] sm:$0xff] }
  0x3b   :  { %v1670_v12 = vld [vmem:[%s2489_s5 + $0x230] sm:$0xff]  ;;  %v1671_v13 = vld [vmem:[%s2489_s5 + $0x238] sm:$0xff]  ;;  %v1661_v16 = vld [vmem:[%s2489_s5 + $0x1e8] sm:$0xff] }
  0x3c   :  { %v1847_v15 = vld [vmem:[%s2485_s1 + $0x18] sm:$0xff]   ;;  %v1668_v17 = vld [vmem:[%s2489_s5 + $0x220] sm:$0xff]  ;;  %v1669_v18 = vld [vmem:[%s2489_s5 + $0x228] sm:$0xff] }
  0x3d   :  { %v1658_v19 = vld [vmem:[%s2489_s5 + $0x1d0] sm:$0xff]  ;;  %v1659_v20 = vld [vmem:[%s2489_s5 + $0x1d8] sm:$0xff]  ;;  %v1656_v23 = vld [vmem:[%s2489_s5 + $0x1c0] sm:$0xff] }
  0x3e   :  { %393 = vperm.xlu0 %1842, %v1571_v32   ;;  %436 = vperm.xlu1 %1843, %v1578_v33   ;;  %v1666_v21 = vld [vmem:[%s2489_s5 + $0x210] sm:$0xff]  ;;  %v1667_v22 = vld [vmem:[%s2489_s5 + $0x218] sm:$0xff]  ;;  %v1657_v24 = vld [vmem:[%s2489_s5 + $0x1c8] sm:$0xff] }
  0x3f   :  { %v1664_v25 = vld [vmem:[%s2489_s5 + $0x200] sm:$0xff]  ;;  %v1665_v26 = vld [vmem:[%s2489_s5 + $0x208] sm:$0xff]  ;;  %v1680_v27 = vld [vmem:[%s2490_s6 + $0x30] sm:$0xff] }
  0x40   :  { %v1681_v28 = vld [vmem:[%s2490_s6 + $0x38] sm:$0xff]  ;;  %v1682_v29 = vld [vmem:[%s2490_s6 + $0x40] sm:$0xff]  ;;  %v1683_v30 = vld [vmem:[%s2490_s6 + $0x48] sm:$0xff] }
  0x41   :  { %v1678_v31 = vld [vmem:[%s2489_s5 + $0x270] sm:$0xff]  ;;  %v1679_v32 = vld [vmem:[%s2489_s5 + $0x278] sm:$0xff]  ;;  %v1676_v33 = vld [vmem:[%s2489_s5 + $0x260] sm:$0xff] }
  0x42   :  { %441 = vperm.xlu0 %1842, %v1579_v34   ;;  %492 = vperm.xlu1 %1843, %v97_v35   ;;  %v1677_v34 = vld [vmem:[%s2489_s5 + $0x268] sm:$0xff]  ;;  %v1674_v35 = vld [vmem:[%s2489_s5 + $0x250] sm:$0xff] }
  0x46   :  { %497 = vperm.xlu0 %1842, %v98_v36   ;;  %510 = vperm.xlu1 %1843, %v1594_v37   ;;  %v1675_v36 = vld [vmem:[%s2489_s5 + $0x258] sm:$0xff]  ;;  %v1672_v37 = vld [vmem:[%s2489_s5 + $0x240] sm:$0xff] }
  0x4a   :  { %515 = vperm.xlu0 %1842, %v1595_v38   ;;  %603 = vperm.xlu1 %1843, %v1592_v39   ;;  %v1673_v38 = vld [vmem:[%s2489_s5 + $0x248] sm:$0xff]  ;;  %v1684_v39 = vld [vmem:[%s2490_s6 + $0x50] sm:$0xff] }
  0x4e   :  { %608 = vperm.xlu0 %1842, %v1593_v40   ;;  %593 = vperm.xlu1 %1843, %v1590_v41   ;;  %v1685_v40 = vld [vmem:[%s2490_s6 + $0x58] sm:$0xff] }
  0x4f   :  { %v1687_v41 = vld [vmem:[%s2491_s7 + $0x18] sm:$0xff] }
  0x52   :  { %598 = vperm.xlu0 %1842, %v1591_v42   ;;  %583 = vperm.xlu1 %1843, %v1588_v43   ;;  %v1971_v42 = vmov 0.0  }
  0x53   :  { %1758 = vmatprep.subr.bf16.mxu1 %v1971_v42  ;;  %1766 = vmatprep.mubr.msk.bf16.mxu1 %vm1972_vm2, %v1971_v42 }
  0x56   :  { %588 = vperm.xlu0 %1842, %v1589_v44   ;;  %573 = vperm.xlu1 %1843, %v1586_v45  }
  0x5a   :  { %578 = vperm.xlu0 %1842, %v1587_v46   ;;  %723 = vperm.xlu1 %1843, %v1596_v47  }
  0x5e   :  { %728 = vperm.xlu0 %1842, %v1597_v48   ;;  %786 = vperm.xlu1 %1843, %v1598_v49  }
  0x62   :  { %875 = vperm.xlu0 %1842, %v1686_v50   ;;  %902 = vperm.xlu1 %1843, %v1644_v51  }
  0x66   :  { %907 = vperm.xlu0 %1842, %v1645_v52   ;;  %912 = vperm.xlu1 %1843, %v1646_v53  }
  0x6a   :  { %917 = vperm.xlu0 %1842, %v1647_v54   ;;  %1050 = vperm.xlu1 %1843, %v1652_v55  }
  0x6e   :  { %1055 = vperm.xlu0 %1842, %v1653_v56   ;;  %1060 = vperm.xlu1 %1843, %v1654_v57   ;;  %v2341_v56 = vld [vmem:[%s2484_s0 + $0x8] ss:$0 sm:$0xff] }
  0x72   :  { %882 = vperm.xlu0 %1842, %v1640_v58   ;;  %887 = vperm.xlu1 %1843, %v1641_v59  }
  0x76   :  { %1065 = vperm.xlu0 %1842, %v1655_v60   ;;  %892 = vperm.xlu1 %1843, %v1642_v61  }
  0x7a   :  { %897 = vperm.xlu0 %1842, %v1643_v62   ;;  %1030 = vperm.xlu1 %1843, %v1648_v63  }
  0x7d   :  { %v111_v3 = vpop.permute.xlu0 %110  ;;  %v143_v43 = vpop.permute.xlu1 %142 }
  0x7e   :  { %v2221_v4 = vmul.f32 %v111_v3, %v2212_v0  ;;  %1035 = vperm.xlu0 %1842, %v1649_v1   ;;  %1040 = vperm.xlu1 %1843, %v1650_v2  }
  0x80   :  { %v114_v6 = vpack.c.bf16 %v2221_v4, %v2221_v4 }
  0x81   :  { %v138_v44 = vpop.permute.xlu0 %137  ;;  %v148_v45 = vpop.permute.xlu1 %147 }
  0x82   :  { %1045 = vperm.xlu0 %1842, %v1651_v5   ;;  %1836 = vmatprep.subr.msk.bf16.mxu0 %vm200_vm1, %v114_v6  ;;  %v202_v8 = vsel %vm200_vm1, %v114_v6, 0 }
  0x83   :  { %1749 = vmatpush3.bf16.msra.mxu0 %v202_v8  ;;  %1176 = vperm.xlu1 %1843, %v1662_v7  }
  0x85   :  { %v153_v46 = vpop.permute.xlu0 %152  ;;  %v292_v47 = vpop.permute.xlu1 %291 }
  0x86   :  { %1181 = vperm.xlu0 %1842, %v1663_v10   ;;  %1751 = vmatmul.mubr.msk.bf16.vlgmr.msra.gmra.mxu0 %vm187_vm0, %v1845_v9 }
  0x87   :  { %1754 = vmatprep.mubr.msk.bf16.mxu0 %vm187_vm0, %v1846_v11  ;;  %1224 = vperm.xlu1 %1843, %v1670_v12  }
  0x89   :  { %v297_v48 = vpop.permute.xlu0 %296  ;;  %v302_v49 = vpop.permute.xlu1 %301 }
  0x8a   :  { %1229 = vperm.xlu0 %1842, %v1671_v13   ;;  %v163_v13 = vmul.f32 %v2341_v56, %v138_v44 }
  0x8b   :  { %1166 = vperm.xlu1 %1843, %v1660_v14  }
  0x8d   :  { %v118_v50 = vpop.permute.xlu0 %117  ;;  %v123_v51 = vpop.permute.xlu1 %122 }
  0x8e   :  { %1171 = vperm.xlu0 %1842, %v1661_v16   ;;  %1755 = vmatmul.mubr.msk.bf16.gmra.mxu0 %vm187_vm0, %v1847_v15  ;;  %v159_v58 = vmul.f32 %v2341_v56, %v118_v50  ;;  %v160_v62 = vmul.f32 %v2341_v56, %v123_v51  ;;  %v164_v16 = vmul.f32 %v2341_v56, %v143_v43 }
  0x8f   :  { %1214 = vperm.xlu1 %1843, %v1668_v17  }
  0x91   :  { %v307_v52 = vpop.permute.xlu0 %306  ;;  %v128_v53 = vpop.permute.xlu1 %127 }
  0x92   :  { %1219 = vperm.xlu0 %1842, %v1669_v18   ;;  %v161_v59 = vmul.f32 %v2341_v56, %v128_v53 }
  0x93   :  { %1156 = vperm.xlu1 %1843, %v1658_v19   ;;  %v165_v19 = vmul.f32 %v2341_v56, %v148_v45 }
  0x95   :  { %v133_v54 = vpop.permute.xlu0 %132  ;;  %v272_v60 = vpop.permute.xlu1 %271 }
  0x96   :  { %1161 = vperm.xlu0 %1842, %v1659_v20   ;;  %v162_v3 = vmul.f32 %v2341_v56, %v133_v54 }
  0x97   :  { %1204 = vperm.xlu1 %1843, %v1666_v21  }
  0x99   :  { %v277_v1 = vpop.permute.xlu0 %276  ;;  %v282_v11 = vpop.permute.xlu1 %281 }
  0x9a   :  { %1209 = vperm.xlu0 %1842, %v1667_v22  }
  0x9b   :  { %1146 = vperm.xlu1 %1843, %v1656_v23  }
  0x9d   :  { %v287_v17 = vpop.permute.xlu0 %286 }
  0x9e   :  { %1151 = vperm.xlu0 %1842, %v1657_v24   ;;  %v166_v24 = vmul.f32 %v2341_v56, %v153_v46 }
  0x9f   :  { %1194 = vperm.xlu1 %1843, %v1664_v25  }
  0xa2   :  { %1199 = vperm.xlu0 %1842, %v1665_v26  }
  0xa3   :  { %1250 = vperm.xlu1 %1843, %v1680_v27  }
  0xa6   :  { %1255 = vperm.xlu0 %1842, %v1681_v28  }
  0xa7   :  { %1268 = vperm.xlu1 %1843, %v1682_v29  }
  0xaa   :  { %1273 = vperm.xlu0 %1842, %v1683_v30  }
  0xab   :  { %1360 = vperm.xlu1 %1843, %v1678_v31  }
  0xae   :  { %1365 = vperm.xlu0 %1842, %v1679_v32  }
  0xaf   :  { %1350 = vperm.xlu1 %1843, %v1676_v33  }
  0xb2   :  { %1355 = vperm.xlu0 %1842, %v1677_v34  }
  0xb3   :  { %1340 = vperm.xlu1 %1843, %v1674_v35  }
  0xb6   :  { %1345 = vperm.xlu0 %1842, %v1675_v36  }
  0xb7   :  { %1330 = vperm.xlu1 %1843, %v1672_v37  }
  0xba   :  { %1335 = vperm.xlu0 %1842, %v1673_v38  }
  0xbb   :  { %1479 = vperm.xlu1 %1843, %v1684_v39  }
  0xbe   :  { %1484 = vperm.xlu0 %1842, %v1685_v40  }
  0xbf   :  { %1542 = vperm.xlu1 %1843, %v1687_v41  }
 0x146   :  { %v1752_v55 = vpop.f32.mrf.mxu0 }
 0x147   :  { %v247_v5 = vadd.f32 %v1752_v55, %v161_v59 }
 0x148   :  { %v238_v57 = vpop.f32.mrf.mxu0 }
 0x149   :  { %v239_v63 = vadd.f32 %v238_v57, %v159_v58  ;;  %v311_v14 = vadd.f32 %v282_v11, %v247_v5 }
 0x14a   :  { %v1753_v61 = vpop.f32.mrf.mxu0 }
 0x14b   :  { %v309_v8 = vadd.f32 %v272_v60, %v239_v63  ;;  %v250_v9 = vadd.f32 %v1753_v61, %v162_v3 }
 0x14c   :  { %v241_v2 = vpop.f32.mrf.mxu0 }
 0x14d   :  { %v242_v6 = vadd.f32 %v241_v2, %v160_v62  ;;  %v312_v20 = vadd.f32 %v287_v17, %v250_v9  ;;  %v424_v17 = vpop.permute.xlu0 %423 }
 0x14e   :  { %v1756_v7 = vpop.f32.mrf.mxu0 }
 0x14f   :  { %v310_v10 = vadd.f32 %v277_v1, %v242_v6  ;;  %v263_v26 = vadd.f32 %v1756_v7, %v165_v19  ;;  %v419_v19 = vpop.permute.xlu1 %418 }
 0x150   :  { %v254_v12 = vpop.f32.mrf.mxu0 }
 0x151   :  { %v317_v15 = vadd.f32 %v310_v10, %v309_v8  ;;  %v255_v22 = vadd.f32 %v254_v12, %v163_v13  ;;  %v315_v33 = vadd.f32 %v302_v49, %v263_v26 }
 0x152   :  { %v1757_v18 = vpop.f32.mrf.mxu0 }
 0x153   :  { %v318_v21 = vadd.f32 %v317_v15, %v311_v14  ;;  %v313_v29 = vadd.f32 %v292_v47, %v255_v22  ;;  %v266_v30 = vadd.f32 %v1757_v18, %v166_v24 }
 0x154   :  { %v257_v23 = vpop.f32.mrf.mxu0 }
 0x155   :  { %v319_v25 = vadd.f32 %v318_v21, %v312_v20  ;;  %v258_v27 = vadd.f32 %v257_v23, %v164_v16  ;;  %v316_v36 = vadd.f32 %v307_v52, %v266_v30  ;;  %v472_v23 = vpop.permute.xlu0 %471 }
 0x157   :  { %v320_v28 = vrot.slane %v319_v25, 4  ;;  %v314_v31 = vadd.f32 %v297_v48, %v258_v27 }
 0x159   :  { %v321_v32 = vadd.f32 %v320_v28, %v319_v25  ;;  %v352_v34 = vadd.f32 %v314_v31, %v313_v29  ;;  %v467_v25 = vpop.permute.xlu1 %466  ;;  %v414_v30 = vpop.permute.xlu0 %413 }
 0x15b   :  { %v322_v35 = vrot.slane %v321_v32, 2  ;;  %v353_v37 = vadd.f32 %v352_v34, %v315_v33 }
 0x15d   :  { %v323_v38 = vadd.f32 %v322_v35, %v321_v32  ;;  %v354_v39 = vadd.f32 %v353_v37, %v316_v36  ;;  %v409_v32 = vpop.permute.xlu1 %408  ;;  %v462_v34 = vpop.permute.xlu0 %461 }
 0x15f   :  { %v324_v40 = vrot.slane %v323_v38, 1  ;;  %v355_v41 = vrot.slane %v354_v39, 4 }
 0x161   :  { %v325_v43 = vadd.f32 %v324_v40, %v323_v38  ;;  %v356_v44 = vadd.f32 %v355_v41, %v354_v39  ;;  %v457_v35 = vpop.permute.xlu1 %456 }
 0x163   :  { %v327_v45 = vmul.f32 0.03125, %v325_v43  ;;  %v357_v46 = vrot.slane %v356_v44, 2 }
 0x165   :  { %v2351_v50 = vsub.f32 %v309_v8, %v327_v45  ;;  %v2353_v51 = vsub.f32 %v310_v10, %v327_v45  ;;  %v330_v47 = vsub.f32 %v311_v14, %v327_v45  ;;  %v358_v48 = vadd.f32 %v357_v46, %v356_v44  ;;  %v399_v37 = vpop.permute.xlu1 %398 }
 0x166   :  { %v331_v53 = vsub.f32 %v312_v20, %v327_v45 }
 0x167   :  { %v332_v49 = vmul.f32 %v2351_v50, %v2351_v50  ;;  %v333_v52 = vmul.f32 %v2353_v51, %v2353_v51  ;;  %v359_v54 = vrot.slane %v358_v48, 1  ;;  %v334_v55 = vmul.f32 %v330_v47, %v330_v47 }
 0x168   :  { %v335_v59 = vmul.f32 %v331_v53, %v331_v53 }
 0x169   :  { %v336_v57 = vadd.f32 %v333_v52, %v332_v49  ;;  %v360_v58 = vadd.f32 %v359_v54, %v358_v48  ;;  %v447_v46 = vpop.permute.xlu1 %446 }
 0x16b   :  { %v337_v60 = vadd.f32 %v336_v57, %v334_v55  ;;  %v361_v61 = vmul.f32 0.03125, %v360_v58 }
 0x16d   :  { %v338_v62 = vadd.f32 %v337_v60, %v335_v59  ;;  %v362_v63 = vsub.f32 %v313_v29, %v361_v61  ;;  %v363_v1 = vsub.f32 %v314_v31, %v361_v61  ;;  %v364_v2 = vsub.f32 %v315_v33, %v361_v61 }
 0x16e   :  { %v365_v5 = vsub.f32 %v316_v36, %v361_v61  ;;  %v404_v36 = vpop.permute.xlu0 %403 }
 0x16f   :  { %v339_v3 = vrot.slane %v338_v62, 4  ;;  %v366_v6 = vmul.f32 %v362_v63, %v362_v63  ;;  %v367_v7 = vmul.f32 %v363_v1, %v363_v1  ;;  %v368_v9 = vmul.f32 %v364_v2, %v364_v2 }
 0x170   :  { %v369_v12 = vmul.f32 %v365_v5, %v365_v5 }
 0x171   :  { %v340_v8 = vadd.f32 %v339_v3, %v338_v62  ;;  %v370_v10 = vadd.f32 %v367_v7, %v366_v6 }
 0x172   :  { %v452_v40 = vpop.permute.xlu0 %451 }
 0x173   :  { %v341_v11 = vrot.slane %v340_v8, 2  ;;  %v371_v13 = vadd.f32 %v370_v10, %v368_v9 }
 0x175   :  { %v342_v14 = vadd.f32 %v341_v11, %v340_v8  ;;  %v372_v15 = vadd.f32 %v371_v13, %v369_v12 }
 0x176   :  { %v394_v3 = vpop.permute.xlu0 %393 }
 0x177   :  { %v343_v16 = vrot.slane %v342_v14, 1  ;;  %v373_v18 = vrot.slane %v372_v15, 4 }
 0x179   :  { %v374_v20 = vadd.f32 %v373_v18, %v372_v15  ;;  %v344_v21 = vadd.f32 %v343_v16, %v342_v14 }
 0x17a   :  { %v442_v8 = vpop.permute.xlu0 %441 }
 0x17b   :  { %v375_v22 = vrot.slane %v374_v20, 2  ;;  %v345_v26 = vmul.f32 0.03125, %v344_v21 }
 0x17d   :  { %v376_v24 = vadd.f32 %v375_v22, %v374_v20  ;;  %v346_v29 = vadd.f32 1e-05, %v345_v26  ;;  %v1848_v22 = vld [vmem:[%s2486_s2] sm:$0xff]  }
 0x17f   :  { %v377_v27 = vrot.slane %v376_v24, 1  ;;  %1864 = vrsqrt.f32 %v346_v29 }
 0x181   :  { %v378_v28 = vadd.f32 %v377_v27, %v376_v24  ;;  %v498_v24 = vpop.permute.xlu0 %497 }
 0x182   :  { %v501_v27 = vmul.f32 %v2341_v56, %v498_v24 }
 0x183   :  { %v379_v31 = vmul.f32 0.03125, %v378_v28 }
 0x185   :  { %v380_v33 = vadd.f32 1e-05, %v379_v31 }
 0x187   :  { %1866 = vrsqrt.f32 %v380_v33 }
 0x18c   :  { %v1865_v38 = vpop.eup %1864 }
 0x18d   :  { %v350_v48 = vmul.f32 %v1865_v38, %v330_v47  ;;  %v351_v49 = vmul.f32 %v1865_v38, %v331_v53  ;;  %v349_v60 = vmul.f32 %v1865_v38, %v2353_v51  ;;  %v348_v6 = vmul.f32 %v1865_v38, %v2351_v50 }
 0x18f   :  { %v428_v61 = vmul.f32 %v399_v37, %v350_v48  ;;  %v427_v47 = vmul.f32 %v394_v3, %v349_v60 }
 0x191   :  { %v476_v53 = vadd.f32 %v447_v46, %v428_v61  ;;  %v475_v10 = vadd.f32 %v442_v8, %v427_v47 }
 0x194   :  { %v1867_v39 = vpop.eup %1866 }
 0x195   :  { %v382_v41 = vmul.f32 %v1867_v39, %v362_v63  ;;  %v383_v43 = vmul.f32 %v1867_v39, %v363_v1  ;;  %v384_v44 = vmul.f32 %v1867_v39, %v364_v2  ;;  %v385_v45 = vmul.f32 %v1867_v39, %v365_v5  ;;  %v389_v2 = vpop.permute.xlu1 %388 }
 0x196   :  { %v429_v1 = vmul.f32 %v404_v36, %v351_v49  ;;  %v426_v5 = vmul.f32 %v389_v2, %v348_v6 }
 0x197   :  { %v430_v52 = vmul.f32 %v409_v32, %v382_v41  ;;  %v431_v54 = vmul.f32 %v414_v30, %v383_v43  ;;  %v432_v55 = vmul.f32 %v419_v19, %v384_v44  ;;  %v433_v57 = vmul.f32 %v424_v17, %v385_v45  ;;  %v516_v32 = vpop.permute.xlu0 %515  ;;  %v1850_v41 = vld [vmem:[%s2487_s3 + $0x8] sm:$0xff]   ;;  %v1851_v43 = vld [vmem:[%s2487_s3 + $0x10] sm:$0xff]   ;;  %v1852_v44 = vld [vmem:[%s2487_s3 + $0x18] sm:$0xff]  }
 0x198   :  { %v477_v7 = vadd.f32 %v452_v40, %v429_v1 }
 0x199   :  { %v480_v58 = vadd.f32 %v467_v25, %v432_v55  ;;  %v481_v59 = vadd.f32 %v472_v23, %v433_v57  ;;  %v479_v62 = vadd.f32 %v462_v34, %v431_v54  ;;  %v478_v63 = vadd.f32 %v457_v35, %v430_v52  ;;  %v437_v9 = vpop.permute.xlu1 %436  ;;  %v1849_v23 = vld [vmem:[%s2487_s3] sm:$0xff]  }
 0x19a   :  { %v474_v51 = vadd.f32 %v437_v9, %v426_v5  ;;  %1772 = vmatprep.mubr.msk.bf16.mxu0 %vm631_vm4, %v1849_v23 }
 0x19b   :  { %1868 = vtanh.f32 %v480_v58  ;;  %v609_v46 = vpop.permute.xlu0 %608 }
 0x19c   :  { %1870 = vtanh.f32 %v481_v59 }
 0x19d   :  { %1872 = vtanh.f32 %v479_v62  ;;  %v493_v25 = vpop.permute.xlu1 %492 }
 0x19e   :  { %1874 = vtanh.f32 %v478_v63  ;;  %v500_v26 = vmul.f32 %v2341_v56, %v493_v25 }
 0x19f   :  { %1876 = vtanh.f32 %v476_v53  ;;  %v599_v55 = vpop.permute.xlu0 %598 }
 0x1a0   :  { %1878 = vtanh.f32 %v477_v7 }
 0x1a1   :  { %1880 = vtanh.f32 %v475_v10  ;;  %v511_v29 = vpop.permute.xlu1 %510 }
 0x1a2   :  { %1882 = vtanh.f32 %v474_v51 }
 0x1a3   :  { %1884 = vtanh.f32 %v500_v26  ;;  %v589_v3 = vpop.permute.xlu0 %588 }
 0x1a4   :  { %1886 = vtanh.f32 %v501_v27 }
 0x1a5   :  { %v604_v49 = vpop.permute.xlu1 %603 }
 0x1a7   :  { %v579_v5 = vpop.permute.xlu0 %578 }
 0x1a8   :  { %v1869_v50 = vpop.eup %1868 }
 0x1a9   :  { %v1871_v11 = vpop.eup %1870  ;;  %v594_v58 = vpop.permute.xlu1 %593 }
 0x1aa   :  { %v1873_v12 = vpop.eup %1872  ;;  %v507_v13 = vpack.c.bf16 %v1871_v11, %v1869_v50 }
 0x1ab   :  { %v1875_v14 = vpop.eup %1874 }
 0x1ac   :  { %1759 = vmatpush3.bf16.msra.mxu1 %v507_v13  ;;  %v1877_v15 = vpop.eup %1876  ;;  %v506_v16 = vpack.c.bf16 %v1873_v12, %v1875_v14 }
 0x1ad   :  { %1760 = vmatprep.subr.bf16.mxu1 %v1971_v42  ;;  %v1879_v17 = vpop.eup %1878  ;;  %v584_v2 = vpop.permute.xlu1 %583 }
 0x1ae   :  { %v1881_v18 = vpop.eup %1880  ;;  %v505_v19 = vpack.c.bf16 %v1879_v17, %v1877_v15 }
 0x1af   :  { %v1883_v20 = vpop.eup %1882 }
 0x1b0   :  { %1761 = vmatpush3.bf16.msra.mxu1 %v506_v16  ;;  %v504_v21 = vpack.c.bf16 %v1881_v18, %v1883_v20  ;;  %v1885_v34 = vpop.eup %1884  ;;  %v1853_v20 = vld [vmem:[%s2488_s4] sm:$0xff]  }
 0x1b1   :  { %1762 = vmatprep.subr.bf16.mxu1 %v1971_v42  ;;  %v1887_v36 = vpop.eup %1886  ;;  %v574_v8 = vpop.permute.xlu1 %573 }
 0x1b4   :  { %1763 = vmatpush3.bf16.msra.mxu1 %v505_v19 }
 0x1b5   :  { %1764 = vmatprep.subr.bf16.mxu1 %v1971_v42 }
 0x1b8   :  { %1765 = vmatpush3.bf16.msra.mxu1 %v504_v21  ;;  %v1854_v21 = vld [vmem:[%s2485_s1 + $0x20] sm:$0xff]  }
 0x1b9   :  { %1780 = vmatprep.subr.bf16.mxu1 %v1971_v42 }
 0x1bb   :  { %1767 = vmatmul.mubr.msk.bf16.vlgmr.msra.gmra.mxu1 %vm523_vm3, %v1848_v22  ;;  %v724_v22 = vpop.permute.xlu1 %723 }
 0x1bc   :  { %1788 = vmatprep.mubr.msk.bf16.mxu1 %vm1972_vm2, %v1971_v42 }
 0x27b   :  { %v561_v28 = vpop.f32.mrf.mxu1 }
 0x27c   :  { %v562_v31 = vadd.f32 %v561_v28, %v511_v29 }
 0x27d   :  { %v1768_v30 = vpop.f32.mrf.mxu1 }
 0x27e   :  { %v568_v38 = vmul.f32 %v1885_v34, %v562_v31  ;;  %v729_v30 = vpop.permute.xlu0 %728  ;;  %v787_v34 = vpop.permute.xlu1 %786 }
 0x27f   :  { %v564_v33 = vpop.f32.mrf.mxu1 }
 0x280   :  { %v565_v35 = vadd.f32 %v564_v33, %v516_v32 }
 0x281   :  { %v1769_v37 = vpop.f32.mrf.mxu1 }
 0x282   :  { %v569_v39 = vmul.f32 %v1887_v36, %v565_v35  ;;  %v876_v37 = vpop.permute.xlu0 %875 }
 0x284   :  { %v570_v40 = vpack.c.bf16 %v569_v39, %v568_v38 }
 0x286   :  { %1770 = vmatprep.subr.bf16.mxu0 %v570_v40 }
 0x287   :  { %1771 = vmatpush3.bf16.msra.mxu0 %v570_v40 }
 0x28a   :  { %1773 = vmatmul.mubr.msk.bf16.vlgmr.msra.gmra.mxu0 %vm631_vm4, %v1850_v41  ;;  %v1857_v41 = vld [vmem:[%s2485_s1 + $0x38] sm:$0xff]  }
 0x28b   :  { %1776 = vmatprep.mubr.msk.bf16.mxu0 %vm631_vm4, %v1851_v43  ;;  %v903_v43 = vpop.permute.xlu1 %902 }
 0x292   :  { %1777 = vmatmul.mubr.msk.bf16.gmra.mxu0 %vm631_vm4, %v1852_v44  ;;  %v908_v44 = vpop.permute.xlu0 %907 }
 0x293   :  { %1794 = vmatprep.mubr.msk.bf16.mxu0 %vm187_vm0, %v1854_v21 }
 0x34a   :  { %v1774_v45 = vpop.f32.mrf.mxu0 }
 0x34b   :  { %v687_v53 = vadd.f32 %v1774_v45, %v584_v2  ;;  %v913_v45 = vpop.permute.xlu1 %912 }
 0x34c   :  { %v678_v48 = vpop.f32.mrf.mxu0 }
 0x34d   :  { %v679_v9 = vadd.f32 %v678_v48, %v574_v8 }
 0x34e   :  { %v1775_v52 = vpop.f32.mrf.mxu0 }
 0x34f   :  { %v690_v47 = vadd.f32 %v1775_v52, %v589_v3  ;;  %v1051_v48 = vpop.permute.xlu1 %1050 }
 0x350   :  { %v681_v54 = vpop.f32.mrf.mxu0 }
 0x351   :  { %v682_v7 = vadd.f32 %v681_v54, %v579_v5 }
 0x352   :  { %v1778_v57 = vpop.f32.mrf.mxu0 }
 0x353   :  { %v703_v59 = vadd.f32 %v1778_v57, %v604_v49  ;;  %v1061_v52 = vpop.permute.xlu1 %1060 }
 0x354   :  { %v694_v60 = vpop.f32.mrf.mxu0 }
 0x355   :  { %1888 = vtanh.f32 %v703_v59  ;;  %v695_v63 = vadd.f32 %v694_v60, %v594_v58 }
 0x356   :  { %v1779_v61 = vpop.f32.mrf.mxu0 }
 0x357   :  { %v706_v62 = vadd.f32 %v1779_v61, %v609_v46  ;;  %v918_v46 = vpop.permute.xlu0 %917 }
 0x358   :  { %v697_v6 = vpop.f32.mrf.mxu0 }
 0x359   :  { %1890 = vtanh.f32 %v706_v62  ;;  %v698_v1 = vadd.f32 %v697_v6, %v599_v55  ;;  %v888_v55 = vpop.permute.xlu1 %887 }
 0x35b   :  { %1892 = vtanh.f32 %v698_v1  ;;  %v1056_v49 = vpop.permute.xlu0 %1055 }
 0x35c   :  { %1894 = vtanh.f32 %v695_v63  ;;  %v921_v63 = vmul.f32 %v2341_v56, %v888_v55 }
 0x35d   :  { %1896 = vtanh.f32 %v690_v47  ;;  %v893_v58 = vpop.permute.xlu1 %892 }
 0x35e   :  { %1898 = vtanh.f32 %v687_v53  ;;  %v922_v1 = vmul.f32 %v2341_v56, %v893_v58 }
 0x35f   :  { %1900 = vtanh.f32 %v682_v7  ;;  %v883_v54 = vpop.permute.xlu0 %882 }
 0x360   :  { %1902 = vtanh.f32 %v679_v9  ;;  %v920_v62 = vmul.f32 %v2341_v56, %v883_v54 }
 0x361   :  { %v1031_v3 = vpop.permute.xlu1 %1030 }
 0x362   :  { %v1889_v10 = vpop.eup %1888 }
 0x363   :  { %v1066_v57 = vpop.permute.xlu0 %1065 }
 0x366   :  { %v1891_v51 = vpop.eup %1890 }
 0x367   :  { %v720_v50 = vpack.c.bf16 %v1891_v51, %v1889_v10  ;;  %v898_v59 = vpop.permute.xlu0 %897 }
 0x368   :  { %v1893_v11 = vpop.eup %1892  ;;  %v923_v5 = vmul.f32 %v2341_v56, %v898_v59 }
 0x369   :  { %1781 = vmatpush3.bf16.msra.mxu1 %v720_v50  ;;  %v1895_v12 = vpop.eup %1894 }
 0x36a   :  { %1782 = vmatprep.subr.bf16.mxu1 %v1971_v42  ;;  %v719_v13 = vpack.c.bf16 %v1893_v11, %v1895_v12  ;;  %v1897_v14 = vpop.eup %1896  ;;  %v1041_v11 = vpop.permute.xlu1 %1040 }
 0x36b   :  { %v1899_v15 = vpop.eup %1898  ;;  %v1036_v47 = vpop.permute.xlu0 %1035 }
 0x36c   :  { %v718_v16 = vpack.c.bf16 %v1897_v14, %v1899_v15  ;;  %v1901_v17 = vpop.eup %1900 }
 0x36d   :  { %1783 = vmatpush3.bf16.msra.mxu1 %v719_v13  ;;  %v1903_v18 = vpop.eup %1902  ;;  %v924_v13 = vmul.f32 %v2341_v56, %v903_v43 }
 0x36e   :  { %1784 = vmatprep.subr.bf16.mxu1 %v1971_v42  ;;  %v717_v19 = vpack.c.bf16 %v1901_v17, %v1903_v18 }
 0x36f   :  { %v1046_v17 = vpop.permute.xlu0 %1045 }
 0x371   :  { %1785 = vmatpush3.bf16.msra.mxu1 %v718_v16  ;;  %v925_v16 = vmul.f32 %v2341_v56, %v908_v44 }
 0x372   :  { %1786 = vmatprep.subr.bf16.mxu1 %v1971_v42 }
 0x375   :  { %1787 = vmatpush3.bf16.msra.mxu1 %v717_v19  ;;  %v926_v19 = vmul.f32 %v2341_v56, %v913_v45 }
 0x376   :  { %1802 = vmatprep.subr.bf16.mxu1 %v1971_v42 }
 0x378   :  { %1789 = vmatmul.mubr.msk.bf16.vlgmr.msra.gmra.mxu1 %vm523_vm3, %v1853_v20 }
 0x379   :  { %1810 = vmatprep.mubr.msk.bf16.mxu1 %vm1972_vm2, %v1971_v42 }
 0x438   :  { %v773_v23 = vpop.f32.mrf.mxu1 }
 0x439   :  { %v774_v24 = vadd.f32 %v773_v23, %v724_v22 }
 0x43a   :  { %v1790_v25 = vpop.f32.mrf.mxu1 }
 0x43b   :  { %v780_v26 = vmul.f32 1.442695, %v774_v24  ;;  %v927_v24 = vmul.f32 %v2341_v56, %v918_v46 }
 0x43c   :  { %v776_v27 = vpop.f32.mrf.mxu1 }
 0x43d   :  { %1904 = vpow2.f32 %v780_v26  ;;  %v777_v31 = vadd.f32 %v776_v27, %v729_v30 }
 0x43e   :  { %v1791_v28 = vpop.f32.mrf.mxu1 }
 0x44a   :  { %v1905_v29 = vpop.eup %1904 }
 0x44b   :  { %v782_v32 = vmul.f32 %v1905_v29, %v2212_v0  ;;  %v1855_v0 = vld [vmem:[%s2485_s1 + $0x28] sm:$0xff]  }
 0x44d   :  { %v783_v33 = vadd.f32 %v782_v32, %v777_v31 }
 0x44f   :  { %v789_v35 = vmul.f32 %v787_v34, %v783_v33 }
 0x451   :  { %v2405_v36 = vadd.f32 %v789_v35, %v2221_v4  ;;  %v1856_v4 = vld [vmem:[%s2485_s1 + $0x30] sm:$0xff]  }
 0x453   :  { %v2408_v38 = vmul.f32 %v876_v37, %v2405_v36 }
 0x455   :  { %v879_v39 = vpack.c.bf16 %v2408_v38, %v2408_v38 }
 0x457   :  { %1837 = vmatprep.subr.msk.bf16.mxu0 %vm200_vm1, %v879_v39  ;;  %v961_v40 = vsel %vm200_vm1, %v879_v39, 0 }
 0x458   :  { %1793 = vmatpush3.bf16.msra.mxu0 %v961_v40 }
 0x45b   :  { %1795 = vmatmul.mubr.msk.bf16.vlgmr.msra.gmra.mxu0 %vm187_vm0, %v1855_v0 }
 0x45c   :  { %1798 = vmatprep.mubr.msk.bf16.mxu0 %vm187_vm0, %v1856_v4 }
 0x463   :  { %1799 = vmatmul.mubr.msk.bf16.gmra.mxu0 %vm187_vm0, %v1857_v41 }
 0x51b   :  { %v1796_v60 = vpop.f32.mrf.mxu0 }
 0x51c   :  { %v1006_v7 = vadd.f32 %v1796_v60, %v922_v1 }
 0x51d   :  { %v997_v61 = vpop.f32.mrf.mxu0 }
 0x51e   :  { %v998_v2 = vadd.f32 %v997_v61, %v920_v62  ;;  %v1070_v14 = vadd.f32 %v1041_v11, %v1006_v7 }
 0x51f   :  { %v1797_v6 = vpop.f32.mrf.mxu0 }
 0x520   :  { %v1068_v10 = vadd.f32 %v1031_v3, %v998_v2  ;;  %v1009_v51 = vadd.f32 %v1797_v6, %v923_v5 }
 0x521   :  { %v1000_v53 = vpop.f32.mrf.mxu0 }
 0x522   :  { %v1001_v8 = vadd.f32 %v1000_v53, %v921_v63  ;;  %v1071_v20 = vadd.f32 %v1046_v17, %v1009_v51 }
 0x523   :  { %v1800_v9 = vpop.f32.mrf.mxu0 }
 0x524   :  { %v1069_v50 = vadd.f32 %v1036_v47, %v1001_v8  ;;  %v1022_v26 = vadd.f32 %v1800_v9, %v926_v19  ;;  %v1182_v19 = vpop.permute.xlu0 %1181 }
 0x525   :  { %v1013_v12 = vpop.f32.mrf.mxu0 }
 0x526   :  { %v1076_v15 = vadd.f32 %v1069_v50, %v1068_v10  ;;  %v1014_v22 = vadd.f32 %v1013_v12, %v924_v13  ;;  %v1074_v33 = vadd.f32 %v1061_v52, %v1022_v26 }
 0x527   :  { %v1801_v18 = vpop.f32.mrf.mxu0 }
 0x528   :  { %v1077_v21 = vadd.f32 %v1076_v15, %v1070_v14  ;;  %v1072_v29 = vadd.f32 %v1051_v48, %v1014_v22  ;;  %v1025_v30 = vadd.f32 %v1801_v18, %v927_v24  ;;  %v1177_v18 = vpop.permute.xlu1 %1176  ;;  %v1230_v26 = vpop.permute.xlu0 %1229 }
 0x529   :  { %v1016_v23 = vpop.f32.mrf.mxu0 }
 0x52a   :  { %v1078_v25 = vadd.f32 %v1077_v21, %v1071_v20  ;;  %v1017_v27 = vadd.f32 %v1016_v23, %v925_v16  ;;  %v1075_v37 = vadd.f32 %v1066_v57, %v1025_v30 }
 0x52c   :  { %v1079_v28 = vrot.slane %v1078_v25, 4  ;;  %v1073_v31 = vadd.f32 %v1056_v49, %v1017_v27  ;;  %v1225_v24 = vpop.permute.xlu1 %1224 }
 0x52e   :  { %v1080_v32 = vadd.f32 %v1079_v28, %v1078_v25  ;;  %v1110_v34 = vadd.f32 %v1073_v31, %v1072_v29 }
 0x530   :  { %v1081_v35 = vrot.slane %v1080_v32, 2  ;;  %v1111_v39 = vadd.f32 %v1110_v34, %v1074_v33 }
 0x532   :  { %v1082_v40 = vadd.f32 %v1081_v35, %v1080_v32  ;;  %v1112_v0 = vadd.f32 %v1111_v39, %v1075_v37  ;;  %v1172_v32 = vpop.permute.xlu0 %1171 }
 0x534   :  { %v1083_v4 = vrot.slane %v1082_v40, 1  ;;  %v1113_v41 = vrot.slane %v1112_v0, 4 }
 0x536   :  { %v1084_v43 = vadd.f32 %v1083_v4, %v1082_v40  ;;  %v1114_v44 = vadd.f32 %v1113_v41, %v1112_v0  ;;  %v1220_v35 = vpop.permute.xlu0 %1219 }
 0x538   :  { %v1085_v45 = vmul.f32 0.03125, %v1084_v43  ;;  %v1115_v46 = vrot.slane %v1114_v44, 2 }
 0x53a   :  { %v2434_v54 = vsub.f32 %v1068_v10, %v1085_v45  ;;  %v2436_v55 = vsub.f32 %v1069_v50, %v1085_v45  ;;  %v1088_v48 = vsub.f32 %v1070_v14, %v1085_v45  ;;  %v1116_v49 = vadd.f32 %v1115_v46, %v1114_v44  ;;  %v1162_v39 = vpop.permute.xlu0 %1161 }
 0x53b   :  { %v1089_v58 = vsub.f32 %v1071_v20, %v1085_v45 }
 0x53c   :  { %v1090_v52 = vmul.f32 %v2434_v54, %v2434_v54  ;;  %v1091_v57 = vmul.f32 %v2436_v55, %v2436_v55  ;;  %v1117_v59 = vrot.slane %v1116_v49, 1  ;;  %v1092_v60 = vmul.f32 %v1088_v48, %v1088_v48 }
 0x53d   :  { %v1093_v3 = vmul.f32 %v1089_v58, %v1089_v58 }
 0x53e   :  { %v1094_v61 = vadd.f32 %v1091_v57, %v1090_v52  ;;  %v1118_v62 = vadd.f32 %v1117_v59, %v1116_v49  ;;  %v1210_v46 = vpop.permute.xlu0 %1209 }
 0x540   :  { %v1095_v6 = vadd.f32 %v1094_v61, %v1092_v60  ;;  %v1119_v63 = vmul.f32 0.03125, %v1118_v62 }
 0x542   :  { %v1096_v1 = vadd.f32 %v1095_v6, %v1093_v3  ;;  %v1120_v2 = vsub.f32 %v1072_v29, %v1119_v63  ;;  %v1121_v47 = vsub.f32 %v1073_v31, %v1119_v63  ;;  %v1122_v53 = vsub.f32 %v1074_v33, %v1119_v63  ;;  %v1167_v31 = vpop.permute.xlu1 %1166 }
 0x543   :  { %v1123_v7 = vsub.f32 %v1075_v37, %v1119_v63 }
 0x544   :  { %v1097_v5 = vrot.slane %v1096_v1, 4  ;;  %v1124_v8 = vmul.f32 %v1120_v2, %v1120_v2  ;;  %v1125_v9 = vmul.f32 %v1121_v47, %v1121_v47  ;;  %v1126_v51 = vmul.f32 %v1122_v53, %v1122_v53 }
 0x545   :  { %v1127_v12 = vmul.f32 %v1123_v7, %v1123_v7 }
 0x546   :  { %v1098_v10 = vadd.f32 %v1097_v5, %v1096_v1  ;;  %v1128_v50 = vadd.f32 %v1125_v9, %v1124_v8  ;;  %v1215_v34 = vpop.permute.xlu1 %1214 }
 0x548   :  { %v1099_v11 = vrot.slane %v1098_v10, 2  ;;  %v1129_v13 = vadd.f32 %v1128_v50, %v1126_v51 }
 0x54a   :  { %v1100_v14 = vadd.f32 %v1099_v11, %v1098_v10  ;;  %v1130_v15 = vadd.f32 %v1129_v13, %v1127_v12  ;;  %v1157_v37 = vpop.permute.xlu1 %1156 }
 0x54c   :  { %v1101_v16 = vrot.slane %v1100_v14, 1  ;;  %v1131_v17 = vrot.slane %v1130_v15, 4 }
 0x54e   :  { %v1132_v20 = vadd.f32 %v1131_v17, %v1130_v15  ;;  %v1102_v21 = vadd.f32 %v1101_v16, %v1100_v14  ;;  %v1205_v45 = vpop.permute.xlu1 %1204 }
 0x550   :  { %v1133_v22 = vrot.slane %v1132_v20, 2  ;;  %v1103_v25 = vmul.f32 0.03125, %v1102_v21 }
 0x552   :  { %v1134_v23 = vadd.f32 %v1133_v22, %v1132_v20  ;;  %v1104_v29 = vadd.f32 1e-05, %v1103_v25  ;;  %v1147_v5 = vpop.permute.xlu1 %1146  ;;  %v1858_v22 = vld [vmem:[%s2486_s2 + $0x8] sm:$0xff]  }
 0x554   :  { %v1135_v27 = vrot.slane %v1134_v23, 1  ;;  %1906 = vrsqrt.f32 %v1104_v29 }
 0x556   :  { %v1136_v28 = vadd.f32 %v1135_v27, %v1134_v23  ;;  %v1195_v10 = vpop.permute.xlu1 %1194  ;;  %v1859_v23 = vld [vmem:[%s2487_s3 + $0x20] sm:$0xff]  }
 0x557   :  { %1816 = vmatprep.mubr.msk.bf16.mxu0 %vm631_vm4, %v1859_v23 }
 0x558   :  { %v1137_v30 = vmul.f32 0.03125, %v1136_v28 }
 0x55a   :  { %v1138_v33 = vadd.f32 1e-05, %v1137_v30  ;;  %v1251_v25 = vpop.permute.xlu1 %1250 }
 0x55c   :  { %1908 = vrsqrt.f32 %v1138_v33 }
 0x55e   :  { %v1269_v29 = vpop.permute.xlu1 %1268 }
 0x561   :  { %v1907_v40 = vpop.eup %1906 }
 0x562   :  { %v1108_v49 = vmul.f32 %v1907_v40, %v1088_v48  ;;  %v1109_v60 = vmul.f32 %v1907_v40, %v1089_v58  ;;  %v1106_v6 = vmul.f32 %v1907_v40, %v2434_v54 }
 0x564   :  { %v1186_v63 = vmul.f32 %v1157_v37, %v1108_v49  ;;  %v1184_v48 = vmul.f32 %v1147_v5, %v1106_v6  ;;  %v1361_v49 = vpop.permute.xlu1 %1360 }
 0x566   :  { %v1234_v8 = vadd.f32 %v1205_v45, %v1186_v63  ;;  %v1232_v50 = vadd.f32 %v1195_v10, %v1184_v48 }
 0x569   :  { %v1909_v0 = vpop.eup %1908 }
 0x56a   :  { %v1140_v4 = vmul.f32 %v1909_v0, %v1120_v2  ;;  %v1141_v41 = vmul.f32 %v1909_v0, %v1121_v47  ;;  %v1142_v43 = vmul.f32 %v1909_v0, %v1122_v53  ;;  %v1143_v44 = vmul.f32 %v1909_v0, %v1123_v7  ;;  %v1152_v7 = vpop.permute.xlu0 %1151 }
 0x56b   :  { %v1107_v2 = vmul.f32 %v1907_v40, %v2436_v55  ;;  %v1187_v47 = vmul.f32 %v1162_v39, %v1109_v60 }
 0x56c   :  { %v1188_v52 = vmul.f32 %v1167_v31, %v1140_v4  ;;  %v1190_v57 = vmul.f32 %v1177_v18, %v1142_v43  ;;  %v1191_v59 = vmul.f32 %v1182_v19, %v1143_v44  ;;  %v1189_v61 = vmul.f32 %v1172_v32, %v1141_v41  ;;  %v1861_v41 = vld [vmem:[%s2487_s3 + $0x30] sm:$0xff]   ;;  %v1862_v43 = vld [vmem:[%s2487_s3 + $0x38] sm:$0xff]  }
 0x56d   :  { %v1185_v9 = vmul.f32 %v1152_v7, %v1107_v2  ;;  %v1235_v58 = vadd.f32 %v1210_v46, %v1187_v47 }
 0x56e   :  { %v1238_v62 = vadd.f32 %v1225_v24, %v1190_v57  ;;  %v1239_v3 = vadd.f32 %v1230_v26, %v1191_v59  ;;  %v1236_v1 = vadd.f32 %v1215_v34, %v1188_v52  ;;  %v1237_v53 = vadd.f32 %v1220_v35, %v1189_v61  ;;  %v1200_v51 = vpop.permute.xlu0 %1199  ;;  %v1351_v61 = vpop.permute.xlu1 %1350 }
 0x56f   :  { %v1233_v54 = vadd.f32 %v1200_v51, %v1185_v9  ;;  %v1258_v26 = vmul.f32 %v2341_v56, %v1251_v25 }
 0x570   :  { %1910 = vtanh.f32 %v1238_v62 }
 0x571   :  { %1912 = vtanh.f32 %v1239_v3 }
 0x572   :  { %1914 = vtanh.f32 %v1236_v1  ;;  %v1256_v24 = vpop.permute.xlu0 %1255 }
 0x573   :  { %1916 = vtanh.f32 %v1237_v53  ;;  %v1259_v27 = vmul.f32 %v2341_v56, %v1256_v24  ;;  %v1860_v56 = vld [vmem:[%s2487_s3 + $0x28] sm:$0xff]   ;;  %v1341_v53 = vpop.permute.xlu1 %1340 }
 0x574   :  { %1918 = vtanh.f32 %v1234_v8 }
 0x575   :  { %1920 = vtanh.f32 %v1235_v58 }
 0x576   :  { %1922 = vtanh.f32 %v1232_v50  ;;  %v1274_v32 = vpop.permute.xlu0 %1273 }
 0x577   :  { %1924 = vtanh.f32 %v1233_v54  ;;  %v1331_v58 = vpop.permute.xlu1 %1330 }
 0x578   :  { %1926 = vtanh.f32 %v1258_v26 }
 0x579   :  { %1928 = vtanh.f32 %v1259_v27 }
 0x57a   :  { %v1366_v45 = vpop.permute.xlu0 %1365 }
 0x57d   :  { %v1911_v55 = vpop.eup %1910 }
 0x57e   :  { %v1913_v11 = vpop.eup %1912  ;;  %v1356_v59 = vpop.permute.xlu0 %1355 }
 0x57f   :  { %v1915_v12 = vpop.eup %1914  ;;  %v1265_v13 = vpack.c.bf16 %v1913_v11, %v1911_v55 }
 0x580   :  { %v1917_v14 = vpop.eup %1916 }
 0x581   :  { %1803 = vmatpush3.bf16.msra.mxu1 %v1265_v13  ;;  %v1919_v15 = vpop.eup %1918  ;;  %v1264_v16 = vpack.c.bf16 %v1917_v14, %v1915_v12 }
 0x582   :  { %1804 = vmatprep.subr.bf16.mxu1 %v1971_v42  ;;  %v1921_v17 = vpop.eup %1920  ;;  %v1346_v1 = vpop.permute.xlu0 %1345 }
 0x583   :  { %v1923_v18 = vpop.eup %1922  ;;  %v1263_v19 = vpack.c.bf16 %v1921_v17, %v1919_v15 }
 0x584   :  { %v1925_v20 = vpop.eup %1924 }
 0x585   :  { %1805 = vmatpush3.bf16.msra.mxu1 %v1264_v16  ;;  %v1262_v21 = vpack.c.bf16 %v1925_v20, %v1923_v18  ;;  %v1927_v34 = vpop.eup %1926  ;;  %v1480_v20 = vpop.permute.xlu1 %1479 }
 0x586   :  { %1806 = vmatprep.subr.bf16.mxu1 %v1971_v42  ;;  %v1929_v37 = vpop.eup %1928  ;;  %v1336_v8 = vpop.permute.xlu0 %1335 }
 0x589   :  { %1807 = vmatpush3.bf16.msra.mxu1 %v1263_v19  ;;  %v1863_v19 = vld [vmem:[%s2488_s4 + $0x8] sm:$0xff]   ;;  %s1554_s4 = sshll.u32 %s1973_s10, 4  ;;  %s1555_s4 = int_to_ptr.vmem [resolvable:$true] %s1554_s4 }
 0x58a   :  { %1808 = vmatprep.subr.bf16.mxu1 %v1971_v42  ;;  %s1948_s11 = scalar_lea.vmem %s1555_s4, 128  ;;  %p1953_p1 = scmp.lt.s32.totalorder %s1555_s4, %s1555_s4 }
 0x58b   :  { %p1949_p0 = scmp.ne.s32.totalorder %s1555_s4, %s1948_s11  ;;  %p1954_p2 = scmp.lt.s32.totalorder %s1948_s11, %s1948_s11 }
 0x58d   :  { %1809 = vmatpush3.bf16.msra.mxu1 %v1262_v21  ;;  %p1955_p3 = por %p1954_p2, %p1953_p1 }
 0x58e   :  { %1824 = vmatprep.subr.bf16.mxu1 %v1971_v42 }
 0x58f   :  { %p1956_p4 = pnand %p1955_p3, %p1949_p0 }
 0x590   :  { %1811 = vmatmul.mubr.msk.bf16.vlgmr.msra.gmra.mxu1 %vm523_vm3, %v1858_v22 }
 0x591   :  { %1832 = vmatprep.mubr.msk.bf16.mxu1 %vm1972_vm2, %v1971_v42 }
 0x650   :  { %v1318_v28 = vpop.f32.mrf.mxu1 }
 0x651   :  { %v1319_v31 = vadd.f32 %v1318_v28, %v1269_v29  ;;  %v1485_v28 = vpop.permute.xlu0 %1484 }
 0x652   :  { %v1812_v30 = vpop.f32.mrf.mxu1 }
 0x653   :  { %v1325_v40 = vmul.f32 %v1927_v34, %v1319_v31  ;;  %v1543_v31 = vpop.permute.xlu1 %1542 }
 0x654   :  { %v1321_v33 = vpop.f32.mrf.mxu1 }
 0x655   :  { %v1322_v35 = vadd.f32 %v1321_v33, %v1274_v32 }
 0x656   :  { %v1813_v39 = vpop.f32.mrf.mxu1 }
 0x657   :  { %v1326_v0 = vmul.f32 %v1929_v37, %v1322_v35 }
 0x659   :  { %v1327_v4 = vpack.c.bf16 %v1326_v0, %v1325_v40 }
 0x65b   :  { %1814 = vmatprep.subr.bf16.mxu0 %v1327_v4 }
 0x65c   :  { %1815 = vmatpush3.bf16.msra.mxu0 %v1327_v4 }
 0x65f   :  { %1817 = vmatmul.mubr.msk.bf16.vlgmr.msra.gmra.mxu0 %vm631_vm4, %v1860_v56 }
 0x660   :  { %1820 = vmatprep.mubr.msk.bf16.mxu0 %vm631_vm4, %v1861_v41 }
 0x667   :  { %1821 = vmatmul.mubr.msk.bf16.gmra.mxu0 %vm631_vm4, %v1862_v43 }
 0x71f   :  { %v1818_v44 = vpop.f32.mrf.mxu0 }
 0x720   :  { %v1443_v48 = vadd.f32 %v1818_v44, %v1341_v53 }
 0x721   :  { %v1434_v46 = vpop.f32.mrf.mxu0 }
 0x722   :  { %v1435_v10 = vadd.f32 %v1434_v46, %v1331_v58 }
 0x723   :  { %v1819_v52 = vpop.f32.mrf.mxu0 }
 0x724   :  { %v1446_v7 = vadd.f32 %v1819_v52, %v1346_v1 }
 0x725   :  { %v1437_v57 = vpop.f32.mrf.mxu0 }
 0x726   :  { %v1438_v9 = vadd.f32 %v1437_v57, %v1336_v8 }
 0x727   :  { %v1822_v60 = vpop.f32.mrf.mxu0 }
 0x728   :  { %v1459_v62 = vadd.f32 %v1822_v60, %v1361_v49 }
 0x729   :  { %v1450_v3 = vpop.f32.mrf.mxu0 }
 0x72a   :  { %1930 = vtanh.f32 %v1459_v62  ;;  %v1451_v2 = vadd.f32 %v1450_v3, %v1351_v61 }
 0x72b   :  { %v1823_v6 = vpop.f32.mrf.mxu0 }
 0x72c   :  { %v1462_v63 = vadd.f32 %v1823_v6, %v1366_v45 }
 0x72d   :  { %v1453_v5 = vpop.f32.mrf.mxu0 }
 0x72e   :  { %1932 = vtanh.f32 %v1462_v63  ;;  %v1454_v47 = vadd.f32 %v1453_v5, %v1356_v59 }
 0x730   :  { %1934 = vtanh.f32 %v1454_v47 }
 0x731   :  { %1936 = vtanh.f32 %v1451_v2 }
 0x732   :  { %1938 = vtanh.f32 %v1446_v7 }
 0x733   :  { %1940 = vtanh.f32 %v1443_v48 }
 0x734   :  { %1942 = vtanh.f32 %v1438_v9 }
 0x735   :  { %1944 = vtanh.f32 %v1435_v10 }
 0x737   :  { %v1931_v51 = vpop.eup %1930 }
 0x73b   :  { %v1933_v50 = vpop.eup %1932 }
 0x73c   :  { %v1476_v54 = vpack.c.bf16 %v1933_v50, %v1931_v51 }
 0x73d   :  { %v1935_v55 = vpop.eup %1934 }
 0x73e   :  { %1825 = vmatpush3.bf16.msra.mxu1 %v1476_v54  ;;  %v1937_v11 = vpop.eup %1936 }
 0x73f   :  { %1826 = vmatprep.subr.bf16.mxu1 %v1971_v42  ;;  %v1475_v12 = vpack.c.bf16 %v1935_v55, %v1937_v11  ;;  %v1939_v13 = vpop.eup %1938 }
 0x740   :  { %v1941_v14 = vpop.eup %1940 }
 0x741   :  { %v1474_v15 = vpack.c.bf16 %v1939_v13, %v1941_v14  ;;  %v1943_v16 = vpop.eup %1942 }
 0x742   :  { %1827 = vmatpush3.bf16.msra.mxu1 %v1475_v12  ;;  %v1945_v17 = vpop.eup %1944 }
 0x743   :  { %1828 = vmatprep.subr.bf16.mxu1 %v1971_v42  ;;  %v1473_v18 = vpack.c.bf16 %v1943_v16, %v1945_v17 }
 0x746   :  { %1829 = vmatpush3.bf16.msra.mxu1 %v1474_v15 }
 0x747   :  { %1830 = vmatprep.subr.bf16.mxu1 %v1971_v42 }
 0x74a   :  { %1831 = vmatpush3.bf16.msra.mxu1 %v1473_v18 }
 0x74d   :  { %1833 = vmatmul.mubr.msk.bf16.vlgmr.msra.gmra.mxu1 %vm523_vm3, %v1863_v19 }
 0x80d   :  { %v1529_v21 = vpop.f32.mrf.mxu1 }
 0x80e   :  { %v1530_v22 = vadd.f32 %v1529_v21, %v1480_v20 }
 0x80f   :  { %v1834_v23 = vpop.f32.mrf.mxu1 }
 0x810   :  { %v1536_v24 = vmul.f32 1.442695, %v1530_v22 }
 0x811   :  { %v1532_v25 = vpop.f32.mrf.mxu1 }
 0x812   :  { %1946 = vpow2.f32 %v1536_v24  ;;  %v1533_v29 = vadd.f32 %v1532_v25, %v1485_v28 }
 0x813   :  { %v1835_v26 = vpop.f32.mrf.mxu1 }
 0x81f   :  { %v1947_v27 = vpop.eup %1946 }
 0x820   :  { %v1538_v42 = vmul.f32 %v1947_v27, %v2405_v36 }
 0x822   :  { %v1539_v30 = vadd.f32 %v1538_v42, %v1533_v29 }
 0x824   :  { %v1545_v32 = vmul.f32 %v1543_v31, %v1539_v30 }
 0x826   :  { %v1546_v33 = vadd.f32 %v1545_v32, %v2408_v38 }
 0x828   :  { %1547 = vst [vmem:[#allocation2] sm:$0xff] %v1546_v33 }
 0x829   :  { %1959 = shalt.err (!%p1956_p4)
}
 0x82a   :  { %1557 = dma.vmem_to_hbm [thread:$0]  %s1555_s4, 128, %s2492_s8, [#allocation3]  }
 0x82b   :  { %1968 = dma.done.wait [#allocation3], 128  }
 0x82c   :  { %1969 = vsyncadd [#allocation3], 4294967168 }
 0x82d   :  { %1561 = vsyncpa [#allocation3], 1 }

</bundles_post_ra>
